<compile_context>
chip_gen: v6e
topology: v6e:2x2x1
jax: 0.10.0
libtpu: 0.0.40
codegen_flags: <defaults>
</compile_context>

<pallas_src>
from functools import partial

import jax
import jax.numpy as jnp
from jax import lax
from jax.experimental import pallas as pl
from jax.experimental.pallas import tpu as pltpu


# ---------------------------------------------------------------------------
# Kernel
# ---------------------------------------------------------------------------
def _sequence_kernel(xp_ref,                     # (TC, B, 4H) layer-1 pre-acts
                     whh1_ref,                   # (H, 4H)
                     wih2_ref, whh2_ref, b2_ref, # (H, 4H), (H, 4H), (1, 4H)
                     wlin_ref, blin_ref,         # (1, H), (1, 1)
                     out_ref,                    # (B, 128) lane-dense slab
                     state_ref,                  # (4, B, H) scratch: h1,c1,h2,c2
                     *, H, TC, T_real, mask_tail):
    tc = pl.program_id(0)

    @pl.when(tc == 0)
    def _init():
        state_ref[...] = jnp.zeros_like(state_ref)

    B = xp_ref.shape[1]
    G = 4 * H

    # Loop-invariant loads / broadcasts hoisted out of the time loop
    # (JAX does not CSE broadcast_in_dim inside the unrolled loop).
    w_hh1 = whh1_ref[...]
    w_ih2 = wih2_ref[...]
    w_hh2 = whh2_ref[...]
    b2 = jnp.broadcast_to(b2_ref[...], (B, G))

    def activate(gates, c):
        # sigmoid(x) == 0.5*tanh(0.5*x)+0.5 exactly: 1 EUP tanh + VPU FMA.
        # Two whole-block transcendentals over the single packed 128-lane gate
        # block, then 32-lane slices (gate order i, f, g, o as in PyTorch).
        sig = 0.5 * jnp.tanh(0.5 * gates) + 0.5
        th = jnp.tanh(gates)
        i = sig[:, 0 * H:1 * H]
        f = sig[:, 1 * H:2 * H]
        g = th[:, 2 * H:3 * H]
        o = sig[:, 3 * H:4 * H]
        c_new = f * c + i * g
        h_new = o * jnp.tanh(c_new)
        return h_new, c_new

    def step(s, carry):
        h1, c1, h2, c2 = carry
        # Layer 1: input projection (incl. fused bias) was precomputed, so only
        # the K=H hidden-recurrence matmul sits on the serial path.
        g1 = xp_ref[s] + jnp.dot(h1, w_hh1, preferred_element_type=jnp.float32)
        h1n, c1n = activate(g1, c1)
        # Layer 2: both operands are loop carries -> two K=H dots.
        g2 = (jnp.dot(h1n, w_ih2, preferred_element_type=jnp.float32)
              + jnp.dot(h2, w_hh2, preferred_element_type=jnp.float32)
              + b2)
        h2n, c2n = activate(g2, c2)
        if mask_tail:  # static Python flag: only traced when T % TC != 0
            valid = tc * TC + s < T_real
            keep = lambda new, old: jnp.where(valid, new, old)
            h1n, c1n, h2n, c2n = (keep(h1n, h1), keep(c1n, c1),
                                  keep(h2n, h2), keep(c2n, c2))
        return h1n, c1n, h2n, c2n

    carry0 = (state_ref[0], state_ref[1], state_ref[2], state_ref[3])
    h1, c1, h2, c2 = lax.fori_loop(0, TC, step, carry0, unroll=True)

    state_ref[0] = h1
    state_ref[1] = c1
    state_ref[2] = h2
    state_ref[3] = c2

    @pl.when(tc == pl.num_programs(0) - 1)
    def _final():
        # Linear(H, 1): VPU multiply + lane reduction; lane-dense slab store.
        y = jnp.sum(h2 * wlin_ref[...], axis=-1, keepdims=True) + blin_ref[...]
        out_ref[...] = jnp.broadcast_to(y, out_ref.shape)


# ---------------------------------------------------------------------------
# Wrapper
# ---------------------------------------------------------------------------
@jax.jit
def sequence_forward(x_btI, packed):
    """x_btI: [B, T, input_size] (PyTorch layout). Returns [B, 1]."""
    B, T, I = x_btI.shape
    H = packed["whh1"].shape[0]
    G = 4 * H

    # Time-major, then hoist the layer-1 input projection (+ fused bias) out of
    # the recurrence as one batched matmul: (T, B, I) @ (I, 4H) -> (T, B, 4H).
    x_tb = jnp.transpose(x_btI, (1, 0, 2)).astype(jnp.float32)
    x_proj = jnp.einsum("tbi,ig->tbg", x_tb, packed["wih1"]) + packed["b1"]

    # Chunk the T axis: caps the in-kernel unroll at TC and streams x_proj
    # through VMEM in (TC, B, 4H) blocks (long sequences stay HBM-resident).
    TC = min(T, 8)
    n_chunks = pl.cdiv(T, TC)
    T_pad = n_chunks * TC
    mask_tail = T_pad != T
    if mask_tail:
        x_proj = jnp.pad(x_proj, ((0, T_pad - T), (0, 0), (0, 0)))

    kernel = partial(_sequence_kernel, H=H, TC=TC, T_real=T,
                     mask_tail=mask_tail)

    out = pl.pallas_call(
        kernel,
        out_shape=jax.ShapeDtypeStruct((B, 128), jnp.float32),
        grid_spec=pltpu.PrefetchScalarGridSpec(
            num_scalar_prefetch=0,
            grid=(n_chunks,),
            in_specs=[
                pl.BlockSpec((TC, B, G), lambda t: (t, 0, 0)),  # x_proj (streamed)
                pl.BlockSpec((H, G), lambda t: (0, 0)),         # W_hh1
                pl.BlockSpec((H, G), lambda t: (0, 0)),         # W_ih2
                pl.BlockSpec((H, G), lambda t: (0, 0)),         # W_hh2
                pl.BlockSpec((1, G), lambda t: (0, 0)),         # b2
                pl.BlockSpec((1, H), lambda t: (0, 0)),         # w_lin
                pl.BlockSpec((1, 1), lambda t: (0, 0)),         # b_lin
            ],
            out_specs=pl.BlockSpec((B, 128), lambda t: (0, 0)),
            scratch_shapes=[pltpu.VMEM((4, B, H), jnp.float32)],  # h1,c1,h2,c2
        ),
        compiler_params=pltpu.CompilerParams(
            dimension_semantics=("arbitrary",)),
    )(x_proj, packed["whh1"], packed["wih2"], packed["whh2"],
      packed["b2"], packed["wlin"], packed["blin"])
    return out[:, :1]


# ---------------------------------------------------------------------------
# Parameters (PyTorch shapes) and packing into the kernel layout
# ---------------------------------------------------------------------------
def init_params(key, input_size, hidden_size):
    """Deterministic init with the PyTorch parameter shapes.
    LSTMCell: weight_ih [4H, in], weight_hh [4H, H], bias_ih [4H], bias_hh [4H]
    Linear:   weight [1, H], bias [1]"""
    H = hidden_size
    k = 1.0 / jnp.sqrt(jnp.float32(H))
    keys = jax.random.split(key, 10)

    def u(kk, shape):
        return jax.random.uniform(kk, shape, jnp.float32, -k, k)

    return dict(
        w_ih1=u(keys[0], (4 * H, input_size)), w_hh1=u(keys[1], (4 * H, H)),
        b_ih1=u(keys[2], (4 * H,)),            b_hh1=u(keys[3], (4 * H,)),
        w_ih2=u(keys[4], (4 * H, H)),          w_hh2=u(keys[5], (4 * H, H)),
        b_ih2=u(keys[6], (4 * H,)),            b_hh2=u(keys[7], (4 * H,)),
        w_lin=u(keys[8], (1, H)),              b_lin=u(keys[9], (1,)),
    )


def pack_params(p):
    """Repack PyTorch-shaped params into the kernel layout.  Gate order
    (i, f, g, o) is preserved along the 4H axis; with H = 32 the four gates of
    one cell occupy exactly one 128-lane block — no lane padding anywhere."""
    H = p["w_hh1"].shape[1]
    f32 = jnp.float32
    return dict(
        wih1=p["w_ih1"].T.astype(f32),                               # (I, 4H)
        b1=(p["b_ih1"] + p["b_hh1"]).reshape(1, 4 * H).astype(f32),  # (1, 4H)
        whh1=p["w_hh1"].T.astype(f32),                               # (H, 4H)
        wih2=p["w_ih2"].T.astype(f32),                               # (H, 4H)
        whh2=p["w_hh2"].T.astype(f32),                               # (H, 4H)
        b2=(p["b_ih2"] + p["b_hh2"]).reshape(1, 4 * H).astype(f32),  # (1, 4H)
        wlin=p["w_lin"].astype(f32),                                 # (1, H)
        blin=p["b_lin"].reshape(1, 1).astype(f32),                   # (1, 1)
    )


# ---------------------------------------------------------------------------
# Pure-JAX reference (mirrors the PyTorch forward with future=0)
# ---------------------------------------------------------------------------
def _lstm_cell_ref(x, h, c, w_ih, w_hh, b_ih, b_hh):
    H = h.shape[-1]
    gates = x @ w_ih.T + h @ w_hh.T + b_ih + b_hh
    i = jax.nn.sigmoid(gates[:, 0:H])
    f = jax.nn.sigmoid(gates[:, H:2 * H])
    g = jnp.tanh(gates[:, 2 * H:3 * H])
    o = jax.nn.sigmoid(gates[:, 3 * H:4 * H])
    c_new = f * c + i * g
    return o * jnp.tanh(c_new), c_new


def sequence_reference(x_btI, p):
    B, T, I = x_btI.shape
    H = p["w_hh1"].shape[1]
    x_tbI = jnp.transpose(x_btI, (1, 0, 2))

    def step(carry, x_t):
        h1, c1, h2, c2 = carry
        h1, c1 = _lstm_cell_ref(x_t, h1, c1, p["w_ih1"], p["w_hh1"],
                                p["b_ih1"], p["b_hh1"])
        h2, c2 = _lstm_cell_ref(h1, h2, c2, p["w_ih2"], p["w_hh2"],
                                p["b_ih2"], p["b_hh2"])
        y = h2 @ p["w_lin"].T + p["b_lin"]
        return (h1, c1, h2, c2), y

    zeros = jnp.zeros((B, H), jnp.float32)
    _, ys = lax.scan(step, (zeros, zeros, zeros, zeros), x_tbI)
    return ys[-1]                                             # [B, 1]


if __name__ == "__main__":
    B, T, I, H = 2, 8, 4, 32  # batch, seq-len, input_size, hidden_size

    key = jax.random.PRNGKey(0)
    k_param, k_x = jax.random.split(key)
    raw = init_params(k_param, I, H)
    packed = pack_params(raw)
    x = jax.random.normal(k_x, (B, T, I), jnp.float32)        # PyTorch layout

    out = jax.block_until_ready(sequence_forward(x, packed))
    ref = sequence_reference(x, raw)

    assert out.shape == (B, 1), out.shape
    assert jnp.allclose(out, ref, atol=1e-5, rtol=1e-5), (out, ref)

    print("KERNEL_OK")
</pallas_src>

<mosaic_0001>
module attributes {stable_mosaic.version = 11 : i64} {
  func.func @_sequence_kernel(%arg0: i32, %arg1: memref<8x2x128xf32, #tpu.memory_space<vmem>>, %arg2: memref<32x128xf32, #tpu.memory_space<vmem>>, %arg3: memref<32x128xf32, #tpu.memory_space<vmem>>, %arg4: memref<32x128xf32, #tpu.memory_space<vmem>>, %arg5: memref<1x128xf32, #tpu.memory_space<vmem>>, %arg6: memref<1x32xf32, #tpu.memory_space<vmem>>, %arg7: memref<1x1xf32, #tpu.memory_space<vmem>>, %arg8: memref<2x128xf32, #tpu.memory_space<vmem>>, %arg9: memref<4x2x32xf32, #tpu.memory_space<vmem>>) attributes {dimension_semantics = [#tpu.dimension_semantics<arbitrary>], iteration_bounds = array<i64: 1>, scalar_prefetch = 0 : i64, scratch_operands = 1 : i64, tpu.core_type = #tpu.core_type<tc>, window_params = [{transform_indices = @transform_0, window_bounds = array<i64: 8, 2, 128>}, {pipeline_mode = #tpu.pipeline_mode<synchronous>, transform_indices = @transform_1, window_bounds = array<i64: 32, 128>}, {pipeline_mode = #tpu.pipeline_mode<synchronous>, transform_indices = @transform_2, window_bounds = array<i64: 32, 128>}, {pipeline_mode = #tpu.pipeline_mode<synchronous>, transform_indices = @transform_3, window_bounds = array<i64: 32, 128>}, {pipeline_mode = #tpu.pipeline_mode<synchronous>, transform_indices = @transform_4, window_bounds = array<i64: 1, 128>}, {pipeline_mode = #tpu.pipeline_mode<synchronous>, transform_indices = @transform_5, window_bounds = array<i64: 1, 32>}, {pipeline_mode = #tpu.pipeline_mode<synchronous>, transform_indices = @transform_6, window_bounds = array<i64: 1, 1>}, {pipeline_mode = #tpu.pipeline_mode<synchronous>, transform_indices = @transform_7, window_bounds = array<i64: 2, 128>}]} {
    %c0_i32 = arith.constant 0 : i32
    %0 = arith.cmpi eq, %arg0, %c0_i32 : i32
    %1 = arith.extui %0 : i1 to i32
    %c0_i32_0 = arith.constant 0 : i32
    %2 = arith.cmpi ne, %1, %c0_i32_0 : i32
    scf.if %2 {
      %cst_119 = arith.constant 0.000000e+00 : f32
      %376 = vector.broadcast %cst_119 : f32 to vector<4x2x32xf32>
      %c0_120 = arith.constant 0 : index
      %c0_121 = arith.constant 0 : index
      %c0_122 = arith.constant 0 : index
      %377 = vector.load %arg9[%c0_120, %c0_121, %c0_122] : memref<4x2x32xf32, #tpu.memory_space<vmem>>, vector<4x2x32xf32>
      tpu.vector_store %arg9[%c0_120, %c0_121, %c0_122], %376 {strides = array<i32>} : memref<4x2x32xf32, #tpu.memory_space<vmem>>, vector<4x2x32xf32>,
    } else {
    }
    %c0 = arith.constant 0 : index
    %c0_1 = arith.constant 0 : index
    %3 = vector.load %arg2[%c0, %c0_1] : memref<32x128xf32, #tpu.memory_space<vmem>>, vector<32x128xf32>
    %c0_2 = arith.constant 0 : index
    %c0_3 = arith.constant 0 : index
    %4 = vector.load %arg3[%c0_2, %c0_3] : memref<32x128xf32, #tpu.memory_space<vmem>>, vector<32x128xf32>
    %c0_4 = arith.constant 0 : index
    %c0_5 = arith.constant 0 : index
    %5 = vector.load %arg4[%c0_4, %c0_5] : memref<32x128xf32, #tpu.memory_space<vmem>>, vector<32x128xf32>
    %c0_6 = arith.constant 0 : index
    %c0_7 = arith.constant 0 : index
    %6 = vector.load %arg5[%c0_6, %c0_7] : memref<1x128xf32, #tpu.memory_space<vmem>>, vector<1x128xf32>
    %7 = vector.shape_cast %6 : vector<1x128xf32> to vector<1x128xf32>
    %8 = vector.broadcast %7 : vector<1x128xf32> to vector<2x128xf32>
    %c0_8 = arith.constant 0 : index
    %c0_9 = arith.constant 0 : index
    %c0_10 = arith.constant 0 : index
    %9 = vector.load %arg9[%c0_8, %c0_9, %c0_10] : memref<4x2x32xf32, #tpu.memory_space<vmem>>, vector<1x2x32xf32>
    %10 = vector.shape_cast %9 : vector<1x2x32xf32> to vector<2x32xf32>
    %c1 = arith.constant 1 : index
    %c0_11 = arith.constant 0 : index
    %c0_12 = arith.constant 0 : index
    %11 = vector.load %arg9[%c1, %c0_11, %c0_12] : memref<4x2x32xf32, #tpu.memory_space<vmem>>, vector<1x2x32xf32>
    %12 = vector.shape_cast %11 : vector<1x2x32xf32> to vector<2x32xf32>
    %c2 = arith.constant 2 : index
    %c0_13 = arith.constant 0 : index
    %c0_14 = arith.constant 0 : index
    %13 = vector.load %arg9[%c2, %c0_13, %c0_14] : memref<4x2x32xf32, #tpu.memory_space<vmem>>, vector<1x2x32xf32>
    %14 = vector.shape_cast %13 : vector<1x2x32xf32> to vector<2x32xf32>
    %c3 = arith.constant 3 : index
    %c0_15 = arith.constant 0 : index
    %c0_16 = arith.constant 0 : index
    %15 = vector.load %arg9[%c3, %c0_15, %c0_16] : memref<4x2x32xf32, #tpu.memory_space<vmem>>, vector<1x2x32xf32>
    %16 = vector.shape_cast %15 : vector<1x2x32xf32> to vector<2x32xf32>
    %c0_i32_17 = arith.constant 0 : i32
    %17 = arith.index_cast %c0_i32_17 : i32 to index
    %c0_18 = arith.constant 0 : index
    %c0_19 = arith.constant 0 : index
    %18 = vector.load %arg1[%17, %c0_18, %c0_19] : memref<8x2x128xf32, #tpu.memory_space<vmem>>, vector<1x2x128xf32>
    %19 = vector.shape_cast %18 : vector<1x2x128xf32> to vector<2x128xf32>
    %cst = arith.constant dense<0.000000e+00> : vector<2x128xf32>
    %20 = tpu.matmul %10, %3, %cst {dimension_numbers = #tpu.dot_dimension_numbers<[1], [0], [0], [1], [0, 0, 1, 1], [], []>} : vector<2x32xf32>, vector<32x128xf32>, vector<2x128xf32> -> vector<2x128xf32>
    %21 = arith.addf %19, %20 : vector<2x128xf32>
    %cst_20 = arith.constant 5.000000e-01 : f32
    %22 = vector.broadcast %cst_20 : f32 to vector<2x128xf32>
    %23 = arith.mulf %22, %21 : vector<2x128xf32>
    %24 = math.tanh %23 : vector<2x128xf32>
    %cst_21 = arith.constant 5.000000e-01 : f32
    %25 = vector.broadcast %cst_21 : f32 to vector<2x128xf32>
    %26 = arith.mulf %25, %24 : vector<2x128xf32>
    %cst_22 = arith.constant 5.000000e-01 : f32
    %27 = vector.broadcast %cst_22 : f32 to vector<2x128xf32>
    %28 = arith.addf %26, %27 : vector<2x128xf32>
    %29 = math.tanh %21 : vector<2x128xf32>
    %30 = vector.extract_strided_slice %28 {offsets = [0, 0], sizes = [2, 32], strides = [1, 1]} : vector<2x128xf32> to vector<2x32xf32>
    %31 = vector.extract_strided_slice %28 {offsets = [0, 32], sizes = [2, 32], strides = [1, 1]} : vector<2x128xf32> to vector<2x32xf32>
    %32 = vector.extract_strided_slice %29 {offsets = [0, 64], sizes = [2, 32], strides = [1, 1]} : vector<2x128xf32> to vector<2x32xf32>
    %33 = vector.extract_strided_slice %28 {offsets = [0, 96], sizes = [2, 32], strides = [1, 1]} : vector<2x128xf32> to vector<2x32xf32>
    %34 = arith.mulf %31, %12 : vector<2x32xf32>
    %35 = arith.mulf %30, %32 : vector<2x32xf32>
    %36 = arith.addf %34, %35 : vector<2x32xf32>
    %37 = math.tanh %36 : vector<2x32xf32>
    %38 = arith.mulf %33, %37 : vector<2x32xf32>
    %cst_23 = arith.constant dense<0.000000e+00> : vector<2x128xf32>
    %39 = tpu.matmul %38, %4, %cst_23 {dimension_numbers = #tpu.dot_dimension_numbers<[1], [0], [0], [1], [0, 0, 1, 1], [], []>} : vector<2x32xf32>, vector<32x128xf32>, vector<2x128xf32> -> vector<2x128xf32>
    %cst_24 = arith.constant dense<0.000000e+00> : vector<2x128xf32>
    %40 = tpu.matmul %14, %5, %cst_24 {dimension_numbers = #tpu.dot_dimension_numbers<[1], [0], [0], [1], [0, 0, 1, 1], [], []>} : vector<2x32xf32>, vector<32x128xf32>, vector<2x128xf32> -> vector<2x128xf32>
    %41 = arith.addf %39, %40 : vector<2x128xf32>
    %42 = arith.addf %41, %8 : vector<2x128xf32>
    %cst_25 = arith.constant 5.000000e-01 : f32
    %43 = vector.broadcast %cst_25 : f32 to vector<2x128xf32>
    %44 = arith.mulf %43, %42 : vector<2x128xf32>
    %45 = math.tanh %44 : vector<2x128xf32>
    %cst_26 = arith.constant 5.000000e-01 : f32
    %46 = vector.broadcast %cst_26 : f32 to vector<2x128xf32>
    %47 = arith.mulf %46, %45 : vector<2x128xf32>
    %cst_27 = arith.constant 5.000000e-01 : f32
    %48 = vector.broadcast %cst_27 : f32 to vector<2x128xf32>
    %49 = arith.addf %47, %48 : vector<2x128xf32>
    %50 = math.tanh %42 : vector<2x128xf32>
    %51 = vector.extract_strided_slice %49 {offsets = [0, 0], sizes = [2, 32], strides = [1, 1]} : vector<2x128xf32> to vector<2x32xf32>
    %52 = vector.extract_strided_slice %49 {offsets = [0, 32], sizes = [2, 32], strides = [1, 1]} : vector<2x128xf32> to vector<2x32xf32>
    %53 = vector.extract_strided_slice %50 {offsets = [0, 64], sizes = [2, 32], strides = [1, 1]} : vector<2x128xf32> to vector<2x32xf32>
    %54 = vector.extract_strided_slice %49 {offsets = [0, 96], sizes = [2, 32], strides = [1, 1]} : vector<2x128xf32> to vector<2x32xf32>
    %55 = arith.mulf %52, %16 : vector<2x32xf32>
    %56 = arith.mulf %51, %53 : vector<2x32xf32>
    %57 = arith.addf %55, %56 : vector<2x32xf32>
    %58 = math.tanh %57 : vector<2x32xf32>
    %59 = arith.mulf %54, %58 : vector<2x32xf32>
    %c1_i32 = arith.constant 1 : i32
    %60 = arith.index_cast %c1_i32 : i32 to index
    %c0_28 = arith.constant 0 : index
    %c0_29 = arith.constant 0 : index
    %61 = vector.load %arg1[%60, %c0_28, %c0_29] : memref<8x2x128xf32, #tpu.memory_space<vmem>>, vector<1x2x128xf32>
    %62 = vector.shape_cast %61 : vector<1x2x128xf32> to vector<2x128xf32>
    %cst_30 = arith.constant dense<0.000000e+00> : vector<2x128xf32>
    %63 = tpu.matmul %38, %3, %cst_30 {dimension_numbers = #tpu.dot_dimension_numbers<[1], [0], [0], [1], [0, 0, 1, 1], [], []>} : vector<2x32xf32>, vector<32x128xf32>, vector<2x128xf32> -> vector<2x128xf32>
    %64 = arith.addf %62, %63 : vector<2x128xf32>
    %cst_31 = arith.constant 5.000000e-01 : f32
    %65 = vector.broadcast %cst_31 : f32 to vector<2x128xf32>
    %66 = arith.mulf %65, %64 : vector<2x128xf32>
    %67 = math.tanh %66 : vector<2x128xf32>
    %cst_32 = arith.constant 5.000000e-01 : f32
    %68 = vector.broadcast %cst_32 : f32 to vector<2x128xf32>
    %69 = arith.mulf %68, %67 : vector<2x128xf32>
    %cst_33 = arith.constant 5.000000e-01 : f32
    %70 = vector.broadcast %cst_33 : f32 to vector<2x128xf32>
    %71 = arith.addf %69, %70 : vector<2x128xf32>
    %72 = math.tanh %64 : vector<2x128xf32>
    %73 = vector.extract_strided_slice %71 {offsets = [0, 0], sizes = [2, 32], strides = [1, 1]} : vector<2x128xf32> to vector<2x32xf32>
    %74 = vector.extract_strided_slice %71 {offsets = [0, 32], sizes = [2, 32], strides = [1, 1]} : vector<2x128xf32> to vector<2x32xf32>
    %75 = vector.extract_strided_slice %72 {offsets = [0, 64], sizes = [2, 32], strides = [1, 1]} : vector<2x128xf32> to vector<2x32xf32>
    %76 = vector.extract_strided_slice %71 {offsets = [0, 96], sizes = [2, 32], strides = [1, 1]} : vector<2x128xf32> to vector<2x32xf32>
    %77 = arith.mulf %74, %36 : vector<2x32xf32>
    %78 = arith.mulf %73, %75 : vector<2x32xf32>
    %79 = arith.addf %77, %78 : vector<2x32xf32>
    %80 = math.tanh %79 : vector<2x32xf32>
    %81 = arith.mulf %76, %80 : vector<2x32xf32>
    %cst_34 = arith.constant dense<0.000000e+00> : vector<2x128xf32>
    %82 = tpu.matmul %81, %4, %cst_34 {dimension_numbers = #tpu.dot_dimension_numbers<[1], [0], [0], [1], [0, 0, 1, 1], [], []>} : vector<2x32xf32>, vector<32x128xf32>, vector<2x128xf32> -> vector<2x128xf32>
    %cst_35 = arith.constant dense<0.000000e+00> : vector<2x128xf32>
    %83 = tpu.matmul %59, %5, %cst_35 {dimension_numbers = #tpu.dot_dimension_numbers<[1], [0], [0], [1], [0, 0, 1, 1], [], []>} : vector<2x32xf32>, vector<32x128xf32>, vector<2x128xf32> -> vector<2x128xf32>
    %84 = arith.addf %82, %83 : vector<2x128xf32>
    %85 = arith.addf %84, %8 : vector<2x128xf32>
    %cst_36 = arith.constant 5.000000e-01 : f32
    %86 = vector.broadcast %cst_36 : f32 to vector<2x128xf32>
    %87 = arith.mulf %86, %85 : vector<2x128xf32>
    %88 = math.tanh %87 : vector<2x128xf32>
    %cst_37 = arith.constant 5.000000e-01 : f32
    %89 = vector.broadcast %cst_37 : f32 to vector<2x128xf32>
    %90 = arith.mulf %89, %88 : vector<2x128xf32>
    %cst_38 = arith.constant 5.000000e-01 : f32
    %91 = vector.broadcast %cst_38 : f32 to vector<2x128xf32>
    %92 = arith.addf %90, %91 : vector<2x128xf32>
    %93 = math.tanh %85 : vector<2x128xf32>
    %94 = vector.extract_strided_slice %92 {offsets = [0, 0], sizes = [2, 32], strides = [1, 1]} : vector<2x128xf32> to vector<2x32xf32>
    %95 = vector.extract_strided_slice %92 {offsets = [0, 32], sizes = [2, 32], strides = [1, 1]} : vector<2x128xf32> to vector<2x32xf32>
    %96 = vector.extract_strided_slice %93 {offsets = [0, 64], sizes = [2, 32], strides = [1, 1]} : vector<2x128xf32> to vector<2x32xf32>
    %97 = vector.extract_strided_slice %92 {offsets = [0, 96], sizes = [2, 32], strides = [1, 1]} : vector<2x128xf32> to vector<2x32xf32>
    %98 = arith.mulf %95, %57 : vector<2x32xf32>
    %99 = arith.mulf %94, %96 : vector<2x32xf32>
    %100 = arith.addf %98, %99 : vector<2x32xf32>
    %101 = math.tanh %100 : vector<2x32xf32>
    %102 = arith.mulf %97, %101 : vector<2x32xf32>
    %c2_i32 = arith.constant 2 : i32
    %103 = arith.index_cast %c2_i32 : i32 to index
    %c0_39 = arith.constant 0 : index
    %c0_40 = arith.constant 0 : index
    %104 = vector.load %arg1[%103, %c0_39, %c0_40] : memref<8x2x128xf32, #tpu.memory_space<vmem>>, vector<1x2x128xf32>
    %105 = vector.shape_cast %104 : vector<1x2x128xf32> to vector<2x128xf32>
    %cst_41 = arith.constant dense<0.000000e+00> : vector<2x128xf32>
    %106 = tpu.matmul %81, %3, %cst_41 {dimension_numbers = #tpu.dot_dimension_numbers<[1], [0], [0], [1], [0, 0, 1, 1], [], []>} : vector<2x32xf32>, vector<32x128xf32>, vector<2x128xf32> -> vector<2x128xf32>
    %107 = arith.addf %105, %106 : vector<2x128xf32>
    %cst_42 = arith.constant 5.000000e-01 : f32
    %108 = vector.broadcast %cst_42 : f32 to vector<2x128xf32>
    %109 = arith.mulf %108, %107 : vector<2x128xf32>
    %110 = math.tanh %109 : vector<2x128xf32>
    %cst_43 = arith.constant 5.000000e-01 : f32
    %111 = vector.broadcast %cst_43 : f32 to vector<2x128xf32>
    %112 = arith.mulf %111, %110 : vector<2x128xf32>
    %cst_44 = arith.constant 5.000000e-01 : f32
    %113 = vector.broadcast %cst_44 : f32 to vector<2x128xf32>
    %114 = arith.addf %112, %113 : vector<2x128xf32>
    %115 = math.tanh %107 : vector<2x128xf32>
    %116 = vector.extract_strided_slice %114 {offsets = [0, 0], sizes = [2, 32], strides = [1, 1]} : vector<2x128xf32> to vector<2x32xf32>
    %117 = vector.extract_strided_slice %114 {offsets = [0, 32], sizes = [2, 32], strides = [1, 1]} : vector<2x128xf32> to vector<2x32xf32>
    %118 = vector.extract_strided_slice %115 {offsets = [0, 64], sizes = [2, 32], strides = [1, 1]} : vector<2x128xf32> to vector<2x32xf32>
    %119 = vector.extract_strided_slice %114 {offsets = [0, 96], sizes = [2, 32], strides = [1, 1]} : vector<2x128xf32> to vector<2x32xf32>
    %120 = arith.mulf %117, %79 : vector<2x32xf32>
    %121 = arith.mulf %116, %118 : vector<2x32xf32>
    %122 = arith.addf %120, %121 : vector<2x32xf32>
    %123 = math.tanh %122 : vector<2x32xf32>
    %124 = arith.mulf %119, %123 : vector<2x32xf32>
    %cst_45 = arith.constant dense<0.000000e+00> : vector<2x128xf32>
    %125 = tpu.matmul %124, %4, %cst_45 {dimension_numbers = #tpu.dot_dimension_numbers<[1], [0], [0], [1], [0, 0, 1, 1], [], []>} : vector<2x32xf32>, vector<32x128xf32>, vector<2x128xf32> -> vector<2x128xf32>
    %cst_46 = arith.constant dense<0.000000e+00> : vector<2x128xf32>
    %126 = tpu.matmul %102, %5, %cst_46 {dimension_numbers = #tpu.dot_dimension_numbers<[1], [0], [0], [1], [0, 0, 1, 1], [], []>} : vector<2x32xf32>, vector<32x128xf32>, vector<2x128xf32> -> vector<2x128xf32>
    %127 = arith.addf %125, %126 : vector<2x128xf32>
    %128 = arith.addf %127, %8 : vector<2x128xf32>
    %cst_47 = arith.constant 5.000000e-01 : f32
    %129 = vector.broadcast %cst_47 : f32 to vector<2x128xf32>
    %130 = arith.mulf %129, %128 : vector<2x128xf32>
    %131 = math.tanh %130 : vector<2x128xf32>
    %cst_48 = arith.constant 5.000000e-01 : f32
    %132 = vector.broadcast %cst_48 : f32 to vector<2x128xf32>
    %133 = arith.mulf %132, %131 : vector<2x128xf32>
    %cst_49 = arith.constant 5.000000e-01 : f32
    %134 = vector.broadcast %cst_49 : f32 to vector<2x128xf32>
    %135 = arith.addf %133, %134 : vector<2x128xf32>
    %136 = math.tanh %128 : vector<2x128xf32>
    %137 = vector.extract_strided_slice %135 {offsets = [0, 0], sizes = [2, 32], strides = [1, 1]} : vector<2x128xf32> to vector<2x32xf32>
    %138 = vector.extract_strided_slice %135 {offsets = [0, 32], sizes = [2, 32], strides = [1, 1]} : vector<2x128xf32> to vector<2x32xf32>
    %139 = vector.extract_strided_slice %136 {offsets = [0, 64], sizes = [2, 32], strides = [1, 1]} : vector<2x128xf32> to vector<2x32xf32>
    %140 = vector.extract_strided_slice %135 {offsets = [0, 96], sizes = [2, 32], strides = [1, 1]} : vector<2x128xf32> to vector<2x32xf32>
    %141 = arith.mulf %138, %100 : vector<2x32xf32>
    %142 = arith.mulf %137, %139 : vector<2x32xf32>
    %143 = arith.addf %141, %142 : vector<2x32xf32>
    %144 = math.tanh %143 : vector<2x32xf32>
    %145 = arith.mulf %140, %144 : vector<2x32xf32>
    %c3_i32 = arith.constant 3 : i32
    %146 = arith.index_cast %c3_i32 : i32 to index
    %c0_50 = arith.constant 0 : index
    %c0_51 = arith.constant 0 : index
    %147 = vector.load %arg1[%146, %c0_50, %c0_51] : memref<8x2x128xf32, #tpu.memory_space<vmem>>, vector<1x2x128xf32>
    %148 = vector.shape_cast %147 : vector<1x2x128xf32> to vector<2x128xf32>
    %cst_52 = arith.constant dense<0.000000e+00> : vector<2x128xf32>
    %149 = tpu.matmul %124, %3, %cst_52 {dimension_numbers = #tpu.dot_dimension_numbers<[1], [0], [0], [1], [0, 0, 1, 1], [], []>} : vector<2x32xf32>, vector<32x128xf32>, vector<2x128xf32> -> vector<2x128xf32>
    %150 = arith.addf %148, %149 : vector<2x128xf32>
    %cst_53 = arith.constant 5.000000e-01 : f32
    %151 = vector.broadcast %cst_53 : f32 to vector<2x128xf32>
    %152 = arith.mulf %151, %150 : vector<2x128xf32>
    %153 = math.tanh %152 : vector<2x128xf32>
    %cst_54 = arith.constant 5.000000e-01 : f32
    %154 = vector.broadcast %cst_54 : f32 to vector<2x128xf32>
    %155 = arith.mulf %154, %153 : vector<2x128xf32>
    %cst_55 = arith.constant 5.000000e-01 : f32
    %156 = vector.broadcast %cst_55 : f32 to vector<2x128xf32>
    %157 = arith.addf %155, %156 : vector<2x128xf32>
    %158 = math.tanh %150 : vector<2x128xf32>
    %159 = vector.extract_strided_slice %157 {offsets = [0, 0], sizes = [2, 32], strides = [1, 1]} : vector<2x128xf32> to vector<2x32xf32>
    %160 = vector.extract_strided_slice %157 {offsets = [0, 32], sizes = [2, 32], strides = [1, 1]} : vector<2x128xf32> to vector<2x32xf32>
    %161 = vector.extract_strided_slice %158 {offsets = [0, 64], sizes = [2, 32], strides = [1, 1]} : vector<2x128xf32> to vector<2x32xf32>
    %162 = vector.extract_strided_slice %157 {offsets = [0, 96], sizes = [2, 32], strides = [1, 1]} : vector<2x128xf32> to vector<2x32xf32>
    %163 = arith.mulf %160, %122 : vector<2x32xf32>
    %164 = arith.mulf %159, %161 : vector<2x32xf32>
    %165 = arith.addf %163, %164 : vector<2x32xf32>
    %166 = math.tanh %165 : vector<2x32xf32>
    %167 = arith.mulf %162, %166 : vector<2x32xf32>
    %cst_56 = arith.constant dense<0.000000e+00> : vector<2x128xf32>
    %168 = tpu.matmul %167, %4, %cst_56 {dimension_numbers = #tpu.dot_dimension_numbers<[1], [0], [0], [1], [0, 0, 1, 1], [], []>} : vector<2x32xf32>, vector<32x128xf32>, vector<2x128xf32> -> vector<2x128xf32>
    %cst_57 = arith.constant dense<0.000000e+00> : vector<2x128xf32>
    %169 = tpu.matmul %145, %5, %cst_57 {dimension_numbers = #tpu.dot_dimension_numbers<[1], [0], [0], [1], [0, 0, 1, 1], [], []>} : vector<2x32xf32>, vector<32x128xf32>, vector<2x128xf32> -> vector<2x128xf32>
    %170 = arith.addf %168, %169 : vector<2x128xf32>
    %171 = arith.addf %170, %8 : vector<2x128xf32>
    %cst_58 = arith.constant 5.000000e-01 : f32
    %172 = vector.broadcast %cst_58 : f32 to vector<2x128xf32>
    %173 = arith.mulf %172, %171 : vector<2x128xf32>
    %174 = math.tanh %173 : vector<2x128xf32>
    %cst_59 = arith.constant 5.000000e-01 : f32
    %175 = vector.broadcast %cst_59 : f32 to vector<2x128xf32>
    %176 = arith.mulf %175, %174 : vector<2x128xf32>
    %cst_60 = arith.constant 5.000000e-01 : f32
    %177 = vector.broadcast %cst_60 : f32 to vector<2x128xf32>
    %178 = arith.addf %176, %177 : vector<2x128xf32>
    %179 = math.tanh %171 : vector<2x128xf32>
    %180 = vector.extract_strided_slice %178 {offsets = [0, 0], sizes = [2, 32], strides = [1, 1]} : vector<2x128xf32> to vector<2x32xf32>
    %181 = vector.extract_strided_slice %178 {offsets = [0, 32], sizes = [2, 32], strides = [1, 1]} : vector<2x128xf32> to vector<2x32xf32>
    %182 = vector.extract_strided_slice %179 {offsets = [0, 64], sizes = [2, 32], strides = [1, 1]} : vector<2x128xf32> to vector<2x32xf32>
    %183 = vector.extract_strided_slice %178 {offsets = [0, 96], sizes = [2, 32], strides = [1, 1]} : vector<2x128xf32> to vector<2x32xf32>
    %184 = arith.mulf %181, %143 : vector<2x32xf32>
    %185 = arith.mulf %180, %182 : vector<2x32xf32>
    %186 = arith.addf %184, %185 : vector<2x32xf32>
    %187 = math.tanh %186 : vector<2x32xf32>
    %188 = arith.mulf %183, %187 : vector<2x32xf32>
    %c4_i32 = arith.constant 4 : i32
    %189 = arith.index_cast %c4_i32 : i32 to index
    %c0_61 = arith.constant 0 : index
    %c0_62 = arith.constant 0 : index
    %190 = vector.load %arg1[%189, %c0_61, %c0_62] : memref<8x2x128xf32, #tpu.memory_space<vmem>>, vector<1x2x128xf32>
    %191 = vector.shape_cast %190 : vector<1x2x128xf32> to vector<2x128xf32>
    %cst_63 = arith.constant dense<0.000000e+00> : vector<2x128xf32>
    %192 = tpu.matmul %167, %3, %cst_63 {dimension_numbers = #tpu.dot_dimension_numbers<[1], [0], [0], [1], [0, 0, 1, 1], [], []>} : vector<2x32xf32>, vector<32x128xf32>, vector<2x128xf32> -> vector<2x128xf32>
    %193 = arith.addf %191, %192 : vector<2x128xf32>
    %cst_64 = arith.constant 5.000000e-01 : f32
    %194 = vector.broadcast %cst_64 : f32 to vector<2x128xf32>
    %195 = arith.mulf %194, %193 : vector<2x128xf32>
    %196 = math.tanh %195 : vector<2x128xf32>
    %cst_65 = arith.constant 5.000000e-01 : f32
    %197 = vector.broadcast %cst_65 : f32 to vector<2x128xf32>
    %198 = arith.mulf %197, %196 : vector<2x128xf32>
    %cst_66 = arith.constant 5.000000e-01 : f32
    %199 = vector.broadcast %cst_66 : f32 to vector<2x128xf32>
    %200 = arith.addf %198, %199 : vector<2x128xf32>
    %201 = math.tanh %193 : vector<2x128xf32>
    %202 = vector.extract_strided_slice %200 {offsets = [0, 0], sizes = [2, 32], strides = [1, 1]} : vector<2x128xf32> to vector<2x32xf32>
    %203 = vector.extract_strided_slice %200 {offsets = [0, 32], sizes = [2, 32], strides = [1, 1]} : vector<2x128xf32> to vector<2x32xf32>
    %204 = vector.extract_strided_slice %201 {offsets = [0, 64], sizes = [2, 32], strides = [1, 1]} : vector<2x128xf32> to vector<2x32xf32>
    %205 = vector.extract_strided_slice %200 {offsets = [0, 96], sizes = [2, 32], strides = [1, 1]} : vector<2x128xf32> to vector<2x32xf32>
    %206 = arith.mulf %203, %165 : vector<2x32xf32>
    %207 = arith.mulf %202, %204 : vector<2x32xf32>
    %208 = arith.addf %206, %207 : vector<2x32xf32>
    %209 = math.tanh %208 : vector<2x32xf32>
    %210 = arith.mulf %205, %209 : vector<2x32xf32>
    %cst_67 = arith.constant dense<0.000000e+00> : vector<2x128xf32>
    %211 = tpu.matmul %210, %4, %cst_67 {dimension_numbers = #tpu.dot_dimension_numbers<[1], [0], [0], [1], [0, 0, 1, 1], [], []>} : vector<2x32xf32>, vector<32x128xf32>, vector<2x128xf32> -> vector<2x128xf32>
    %cst_68 = arith.constant dense<0.000000e+00> : vector<2x128xf32>
    %212 = tpu.matmul %188, %5, %cst_68 {dimension_numbers = #tpu.dot_dimension_numbers<[1], [0], [0], [1], [0, 0, 1, 1], [], []>} : vector<2x32xf32>, vector<32x128xf32>, vector<2x128xf32> -> vector<2x128xf32>
    %213 = arith.addf %211, %212 : vector<2x128xf32>
    %214 = arith.addf %213, %8 : vector<2x128xf32>
    %cst_69 = arith.constant 5.000000e-01 : f32
    %215 = vector.broadcast %cst_69 : f32 to vector<2x128xf32>
    %216 = arith.mulf %215, %214 : vector<2x128xf32>
    %217 = math.tanh %216 : vector<2x128xf32>
    %cst_70 = arith.constant 5.000000e-01 : f32
    %218 = vector.broadcast %cst_70 : f32 to vector<2x128xf32>
    %219 = arith.mulf %218, %217 : vector<2x128xf32>
    %cst_71 = arith.constant 5.000000e-01 : f32
    %220 = vector.broadcast %cst_71 : f32 to vector<2x128xf32>
    %221 = arith.addf %219, %220 : vector<2x128xf32>
    %222 = math.tanh %214 : vector<2x128xf32>
    %223 = vector.extract_strided_slice %221 {offsets = [0, 0], sizes = [2, 32], strides = [1, 1]} : vector<2x128xf32> to vector<2x32xf32>
    %224 = vector.extract_strided_slice %221 {offsets = [0, 32], sizes = [2, 32], strides = [1, 1]} : vector<2x128xf32> to vector<2x32xf32>
    %225 = vector.extract_strided_slice %222 {offsets = [0, 64], sizes = [2, 32], strides = [1, 1]} : vector<2x128xf32> to vector<2x32xf32>
    %226 = vector.extract_strided_slice %221 {offsets = [0, 96], sizes = [2, 32], strides = [1, 1]} : vector<2x128xf32> to vector<2x32xf32>
    %227 = arith.mulf %224, %186 : vector<2x32xf32>
    %228 = arith.mulf %223, %225 : vector<2x32xf32>
    %229 = arith.addf %227, %228 : vector<2x32xf32>
    %230 = math.tanh %229 : vector<2x32xf32>
    %231 = arith.mulf %226, %230 : vector<2x32xf32>
    %c5_i32 = arith.constant 5 : i32
    %232 = arith.index_cast %c5_i32 : i32 to index
    %c0_72 = arith.constant 0 : index
    %c0_73 = arith.constant 0 : index
    %233 = vector.load %arg1[%232, %c0_72, %c0_73] : memref<8x2x128xf32, #tpu.memory_space<vmem>>, vector<1x2x128xf32>
    %234 = vector.shape_cast %233 : vector<1x2x128xf32> to vector<2x128xf32>
    %cst_74 = arith.constant dense<0.000000e+00> : vector<2x128xf32>
    %235 = tpu.matmul %210, %3, %cst_74 {dimension_numbers = #tpu.dot_dimension_numbers<[1], [0], [0], [1], [0, 0, 1, 1], [], []>} : vector<2x32xf32>, vector<32x128xf32>, vector<2x128xf32> -> vector<2x128xf32>
    %236 = arith.addf %234, %235 : vector<2x128xf32>
    %cst_75 = arith.constant 5.000000e-01 : f32
    %237 = vector.broadcast %cst_75 : f32 to vector<2x128xf32>
    %238 = arith.mulf %237, %236 : vector<2x128xf32>
    %239 = math.tanh %238 : vector<2x128xf32>
    %cst_76 = arith.constant 5.000000e-01 : f32
    %240 = vector.broadcast %cst_76 : f32 to vector<2x128xf32>
    %241 = arith.mulf %240, %239 : vector<2x128xf32>
    %cst_77 = arith.constant 5.000000e-01 : f32
    %242 = vector.broadcast %cst_77 : f32 to vector<2x128xf32>
    %243 = arith.addf %241, %242 : vector<2x128xf32>
    %244 = math.tanh %236 : vector<2x128xf32>
    %245 = vector.extract_strided_slice %243 {offsets = [0, 0], sizes = [2, 32], strides = [1, 1]} : vector<2x128xf32> to vector<2x32xf32>
    %246 = vector.extract_strided_slice %243 {offsets = [0, 32], sizes = [2, 32], strides = [1, 1]} : vector<2x128xf32> to vector<2x32xf32>
    %247 = vector.extract_strided_slice %244 {offsets = [0, 64], sizes = [2, 32], strides = [1, 1]} : vector<2x128xf32> to vector<2x32xf32>
    %248 = vector.extract_strided_slice %243 {offsets = [0, 96], sizes = [2, 32], strides = [1, 1]} : vector<2x128xf32> to vector<2x32xf32>
    %249 = arith.mulf %246, %208 : vector<2x32xf32>
    %250 = arith.mulf %245, %247 : vector<2x32xf32>
    %251 = arith.addf %249, %250 : vector<2x32xf32>
    %252 = math.tanh %251 : vector<2x32xf32>
    %253 = arith.mulf %248, %252 : vector<2x32xf32>
    %cst_78 = arith.constant dense<0.000000e+00> : vector<2x128xf32>
    %254 = tpu.matmul %253, %4, %cst_78 {dimension_numbers = #tpu.dot_dimension_numbers<[1], [0], [0], [1], [0, 0, 1, 1], [], []>} : vector<2x32xf32>, vector<32x128xf32>, vector<2x128xf32> -> vector<2x128xf32>
    %cst_79 = arith.constant dense<0.000000e+00> : vector<2x128xf32>
    %255 = tpu.matmul %231, %5, %cst_79 {dimension_numbers = #tpu.dot_dimension_numbers<[1], [0], [0], [1], [0, 0, 1, 1], [], []>} : vector<2x32xf32>, vector<32x128xf32>, vector<2x128xf32> -> vector<2x128xf32>
    %256 = arith.addf %254, %255 : vector<2x128xf32>
    %257 = arith.addf %256, %8 : vector<2x128xf32>
    %cst_80 = arith.constant 5.000000e-01 : f32
    %258 = vector.broadcast %cst_80 : f32 to vector<2x128xf32>
    %259 = arith.mulf %258, %257 : vector<2x128xf32>
    %260 = math.tanh %259 : vector<2x128xf32>
    %cst_81 = arith.constant 5.000000e-01 : f32
    %261 = vector.broadcast %cst_81 : f32 to vector<2x128xf32>
    %262 = arith.mulf %261, %260 : vector<2x128xf32>
    %cst_82 = arith.constant 5.000000e-01 : f32
    %263 = vector.broadcast %cst_82 : f32 to vector<2x128xf32>
    %264 = arith.addf %262, %263 : vector<2x128xf32>
    %265 = math.tanh %257 : vector<2x128xf32>
    %266 = vector.extract_strided_slice %264 {offsets = [0, 0], sizes = [2, 32], strides = [1, 1]} : vector<2x128xf32> to vector<2x32xf32>
    %267 = vector.extract_strided_slice %264 {offsets = [0, 32], sizes = [2, 32], strides = [1, 1]} : vector<2x128xf32> to vector<2x32xf32>
    %268 = vector.extract_strided_slice %265 {offsets = [0, 64], sizes = [2, 32], strides = [1, 1]} : vector<2x128xf32> to vector<2x32xf32>
    %269 = vector.extract_strided_slice %264 {offsets = [0, 96], sizes = [2, 32], strides = [1, 1]} : vector<2x128xf32> to vector<2x32xf32>
    %270 = arith.mulf %267, %229 : vector<2x32xf32>
    %271 = arith.mulf %266, %268 : vector<2x32xf32>
    %272 = arith.addf %270, %271 : vector<2x32xf32>
    %273 = math.tanh %272 : vector<2x32xf32>
    %274 = arith.mulf %269, %273 : vector<2x32xf32>
    %c6_i32 = arith.constant 6 : i32
    %275 = arith.index_cast %c6_i32 : i32 to index
    %c0_83 = arith.constant 0 : index
    %c0_84 = arith.constant 0 : index
    %276 = vector.load %arg1[%275, %c0_83, %c0_84] : memref<8x2x128xf32, #tpu.memory_space<vmem>>, vector<1x2x128xf32>
    %277 = vector.shape_cast %276 : vector<1x2x128xf32> to vector<2x128xf32>
    %cst_85 = arith.constant dense<0.000000e+00> : vector<2x128xf32>
    %278 = tpu.matmul %253, %3, %cst_85 {dimension_numbers = #tpu.dot_dimension_numbers<[1], [0], [0], [1], [0, 0, 1, 1], [], []>} : vector<2x32xf32>, vector<32x128xf32>, vector<2x128xf32> -> vector<2x128xf32>
    %279 = arith.addf %277, %278 : vector<2x128xf32>
    %cst_86 = arith.constant 5.000000e-01 : f32
    %280 = vector.broadcast %cst_86 : f32 to vector<2x128xf32>
    %281 = arith.mulf %280, %279 : vector<2x128xf32>
    %282 = math.tanh %281 : vector<2x128xf32>
    %cst_87 = arith.constant 5.000000e-01 : f32
    %283 = vector.broadcast %cst_87 : f32 to vector<2x128xf32>
    %284 = arith.mulf %283, %282 : vector<2x128xf32>
    %cst_88 = arith.constant 5.000000e-01 : f32
    %285 = vector.broadcast %cst_88 : f32 to vector<2x128xf32>
    %286 = arith.addf %284, %285 : vector<2x128xf32>
    %287 = math.tanh %279 : vector<2x128xf32>
    %288 = vector.extract_strided_slice %286 {offsets = [0, 0], sizes = [2, 32], strides = [1, 1]} : vector<2x128xf32> to vector<2x32xf32>
    %289 = vector.extract_strided_slice %286 {offsets = [0, 32], sizes = [2, 32], strides = [1, 1]} : vector<2x128xf32> to vector<2x32xf32>
    %290 = vector.extract_strided_slice %287 {offsets = [0, 64], sizes = [2, 32], strides = [1, 1]} : vector<2x128xf32> to vector<2x32xf32>
    %291 = vector.extract_strided_slice %286 {offsets = [0, 96], sizes = [2, 32], strides = [1, 1]} : vector<2x128xf32> to vector<2x32xf32>
    %292 = arith.mulf %289, %251 : vector<2x32xf32>
    %293 = arith.mulf %288, %290 : vector<2x32xf32>
    %294 = arith.addf %292, %293 : vector<2x32xf32>
    %295 = math.tanh %294 : vector<2x32xf32>
    %296 = arith.mulf %291, %295 : vector<2x32xf32>
    %cst_89 = arith.constant dense<0.000000e+00> : vector<2x128xf32>
    %297 = tpu.matmul %296, %4, %cst_89 {dimension_numbers = #tpu.dot_dimension_numbers<[1], [0], [0], [1], [0, 0, 1, 1], [], []>} : vector<2x32xf32>, vector<32x128xf32>, vector<2x128xf32> -> vector<2x128xf32>
    %cst_90 = arith.constant dense<0.000000e+00> : vector<2x128xf32>
    %298 = tpu.matmul %274, %5, %cst_90 {dimension_numbers = #tpu.dot_dimension_numbers<[1], [0], [0], [1], [0, 0, 1, 1], [], []>} : vector<2x32xf32>, vector<32x128xf32>, vector<2x128xf32> -> vector<2x128xf32>
    %299 = arith.addf %297, %298 : vector<2x128xf32>
    %300 = arith.addf %299, %8 : vector<2x128xf32>
    %cst_91 = arith.constant 5.000000e-01 : f32
    %301 = vector.broadcast %cst_91 : f32 to vector<2x128xf32>
    %302 = arith.mulf %301, %300 : vector<2x128xf32>
    %303 = math.tanh %302 : vector<2x128xf32>
    %cst_92 = arith.constant 5.000000e-01 : f32
    %304 = vector.broadcast %cst_92 : f32 to vector<2x128xf32>
    %305 = arith.mulf %304, %303 : vector<2x128xf32>
    %cst_93 = arith.constant 5.000000e-01 : f32
    %306 = vector.broadcast %cst_93 : f32 to vector<2x128xf32>
    %307 = arith.addf %305, %306 : vector<2x128xf32>
    %308 = math.tanh %300 : vector<2x128xf32>
    %309 = vector.extract_strided_slice %307 {offsets = [0, 0], sizes = [2, 32], strides = [1, 1]} : vector<2x128xf32> to vector<2x32xf32>
    %310 = vector.extract_strided_slice %307 {offsets = [0, 32], sizes = [2, 32], strides = [1, 1]} : vector<2x128xf32> to vector<2x32xf32>
    %311 = vector.extract_strided_slice %308 {offsets = [0, 64], sizes = [2, 32], strides = [1, 1]} : vector<2x128xf32> to vector<2x32xf32>
    %312 = vector.extract_strided_slice %307 {offsets = [0, 96], sizes = [2, 32], strides = [1, 1]} : vector<2x128xf32> to vector<2x32xf32>
    %313 = arith.mulf %310, %272 : vector<2x32xf32>
    %314 = arith.mulf %309, %311 : vector<2x32xf32>
    %315 = arith.addf %313, %314 : vector<2x32xf32>
    %316 = math.tanh %315 : vector<2x32xf32>
    %317 = arith.mulf %312, %316 : vector<2x32xf32>
    %c7_i32 = arith.constant 7 : i32
    %318 = arith.index_cast %c7_i32 : i32 to index
    %c0_94 = arith.constant 0 : index
    %c0_95 = arith.constant 0 : index
    %319 = vector.load %arg1[%318, %c0_94, %c0_95] : memref<8x2x128xf32, #tpu.memory_space<vmem>>, vector<1x2x128xf32>
    %320 = vector.shape_cast %319 : vector<1x2x128xf32> to vector<2x128xf32>
    %cst_96 = arith.constant dense<0.000000e+00> : vector<2x128xf32>
    %321 = tpu.matmul %296, %3, %cst_96 {dimension_numbers = #tpu.dot_dimension_numbers<[1], [0], [0], [1], [0, 0, 1, 1], [], []>} : vector<2x32xf32>, vector<32x128xf32>, vector<2x128xf32> -> vector<2x128xf32>
    %322 = arith.addf %320, %321 : vector<2x128xf32>
    %cst_97 = arith.constant 5.000000e-01 : f32
    %323 = vector.broadcast %cst_97 : f32 to vector<2x128xf32>
    %324 = arith.mulf %323, %322 : vector<2x128xf32>
    %325 = math.tanh %324 : vector<2x128xf32>
    %cst_98 = arith.constant 5.000000e-01 : f32
    %326 = vector.broadcast %cst_98 : f32 to vector<2x128xf32>
    %327 = arith.mulf %326, %325 : vector<2x128xf32>
    %cst_99 = arith.constant 5.000000e-01 : f32
    %328 = vector.broadcast %cst_99 : f32 to vector<2x128xf32>
    %329 = arith.addf %327, %328 : vector<2x128xf32>
    %330 = math.tanh %322 : vector<2x128xf32>
    %331 = vector.extract_strided_slice %329 {offsets = [0, 0], sizes = [2, 32], strides = [1, 1]} : vector<2x128xf32> to vector<2x32xf32>
    %332 = vector.extract_strided_slice %329 {offsets = [0, 32], sizes = [2, 32], strides = [1, 1]} : vector<2x128xf32> to vector<2x32xf32>
    %333 = vector.extract_strided_slice %330 {offsets = [0, 64], sizes = [2, 32], strides = [1, 1]} : vector<2x128xf32> to vector<2x32xf32>
    %334 = vector.extract_strided_slice %329 {offsets = [0, 96], sizes = [2, 32], strides = [1, 1]} : vector<2x128xf32> to vector<2x32xf32>
    %335 = arith.mulf %332, %294 : vector<2x32xf32>
    %336 = arith.mulf %331, %333 : vector<2x32xf32>
    %337 = arith.addf %335, %336 : vector<2x32xf32>
    %338 = math.tanh %337 : vector<2x32xf32>
    %339 = arith.mulf %334, %338 : vector<2x32xf32>
    %cst_100 = arith.constant dense<0.000000e+00> : vector<2x128xf32>
    %340 = tpu.matmul %339, %4, %cst_100 {dimension_numbers = #tpu.dot_dimension_numbers<[1], [0], [0], [1], [0, 0, 1, 1], [], []>} : vector<2x32xf32>, vector<32x128xf32>, vector<2x128xf32> -> vector<2x128xf32>
    %cst_101 = arith.constant dense<0.000000e+00> : vector<2x128xf32>
    %341 = tpu.matmul %317, %5, %cst_101 {dimension_numbers = #tpu.dot_dimension_numbers<[1], [0], [0], [1], [0, 0, 1, 1], [], []>} : vector<2x32xf32>, vector<32x128xf32>, vector<2x128xf32> -> vector<2x128xf32>
    %342 = arith.addf %340, %341 : vector<2x128xf32>
    %343 = arith.addf %342, %8 : vector<2x128xf32>
    %cst_102 = arith.constant 5.000000e-01 : f32
    %344 = vector.broadcast %cst_102 : f32 to vector<2x128xf32>
    %345 = arith.mulf %344, %343 : vector<2x128xf32>
    %346 = math.tanh %345 : vector<2x128xf32>
    %cst_103 = arith.constant 5.000000e-01 : f32
    %347 = vector.broadcast %cst_103 : f32 to vector<2x128xf32>
    %348 = arith.mulf %347, %346 : vector<2x128xf32>
    %cst_104 = arith.constant 5.000000e-01 : f32
    %349 = vector.broadcast %cst_104 : f32 to vector<2x128xf32>
    %350 = arith.addf %348, %349 : vector<2x128xf32>
    %351 = math.tanh %343 : vector<2x128xf32>
    %352 = vector.extract_strided_slice %350 {offsets = [0, 0], sizes = [2, 32], strides = [1, 1]} : vector<2x128xf32> to vector<2x32xf32>
    %353 = vector.extract_strided_slice %350 {offsets = [0, 32], sizes = [2, 32], strides = [1, 1]} : vector<2x128xf32> to vector<2x32xf32>
    %354 = vector.extract_strided_slice %351 {offsets = [0, 64], sizes = [2, 32], strides = [1, 1]} : vector<2x128xf32> to vector<2x32xf32>
    %355 = vector.extract_strided_slice %350 {offsets = [0, 96], sizes = [2, 32], strides = [1, 1]} : vector<2x128xf32> to vector<2x32xf32>
    %356 = arith.mulf %353, %315 : vector<2x32xf32>
    %357 = arith.mulf %352, %354 : vector<2x32xf32>
    %358 = arith.addf %356, %357 : vector<2x32xf32>
    %359 = math.tanh %358 : vector<2x32xf32>
    %360 = arith.mulf %355, %359 : vector<2x32xf32>
    %c8_i32 = arith.constant 8 : i32
    %c0_105 = arith.constant 0 : index
    %c0_106 = arith.constant 0 : index
    %c0_107 = arith.constant 0 : index
    %361 = vector.load %arg9[%c0_105, %c0_106, %c0_107] : memref<4x2x32xf32, #tpu.memory_space<vmem>>, vector<1x2x32xf32>
    %362 = vector.shape_cast %361 : vector<1x2x32xf32> to vector<2x32xf32>
    %363 = vector.shape_cast %339 : vector<2x32xf32> to vector<1x2x32xf32>
    tpu.vector_store %arg9[%c0_105, %c0_106, %c0_107], %363 {strides = array<i32>} : memref<4x2x32xf32, #tpu.memory_space<vmem>>, vector<1x2x32xf32>,
    %c1_108 = arith.constant 1 : index
    %c0_109 = arith.constant 0 : index
    %c0_110 = arith.constant 0 : index
    %364 = vector.load %arg9[%c1_108, %c0_109, %c0_110] : memref<4x2x32xf32, #tpu.memory_space<vmem>>, vector<1x2x32xf32>
    %365 = vector.shape_cast %364 : vector<1x2x32xf32> to vector<2x32xf32>
    %366 = vector.shape_cast %337 : vector<2x32xf32> to vector<1x2x32xf32>
    tpu.vector_store %arg9[%c1_108, %c0_109, %c0_110], %366 {strides = array<i32>} : memref<4x2x32xf32, #tpu.memory_space<vmem>>, vector<1x2x32xf32>,
    %c2_111 = arith.constant 2 : index
    %c0_112 = arith.constant 0 : index
    %c0_113 = arith.constant 0 : index
    %367 = vector.load %arg9[%c2_111, %c0_112, %c0_113] : memref<4x2x32xf32, #tpu.memory_space<vmem>>, vector<1x2x32xf32>
    %368 = vector.shape_cast %367 : vector<1x2x32xf32> to vector<2x32xf32>
    %369 = vector.shape_cast %360 : vector<2x32xf32> to vector<1x2x32xf32>
    tpu.vector_store %arg9[%c2_111, %c0_112, %c0_113], %369 {strides = array<i32>} : memref<4x2x32xf32, #tpu.memory_space<vmem>>, vector<1x2x32xf32>,
    %c3_114 = arith.constant 3 : index
    %c0_115 = arith.constant 0 : index
    %c0_116 = arith.constant 0 : index
    %370 = vector.load %arg9[%c3_114, %c0_115, %c0_116] : memref<4x2x32xf32, #tpu.memory_space<vmem>>, vector<1x2x32xf32>
    %371 = vector.shape_cast %370 : vector<1x2x32xf32> to vector<2x32xf32>
    %372 = vector.shape_cast %358 : vector<2x32xf32> to vector<1x2x32xf32>
    tpu.vector_store %arg9[%c3_114, %c0_115, %c0_116], %372 {strides = array<i32>} : memref<4x2x32xf32, #tpu.memory_space<vmem>>, vector<1x2x32xf32>,
    %c0_i32_117 = arith.constant 0 : i32
    %373 = arith.cmpi eq, %arg0, %c0_i32_117 : i32
    %374 = arith.extui %373 : i1 to i32
    %c0_i32_118 = arith.constant 0 : i32
    %375 = arith.cmpi ne, %374, %c0_i32_118 : i32
    scf.if %375 {
      %c0_119 = arith.constant 0 : index
      %c0_120 = arith.constant 0 : index
      %376 = vector.load %arg6[%c0_119, %c0_120] : memref<1x32xf32, #tpu.memory_space<vmem>>, vector<1x32xf32>
      %377 = vector.broadcast %376 : vector<1x32xf32> to vector<2x32xf32>
      %378 = arith.mulf %360, %377 : vector<2x32xf32>
      %cst_121 = arith.constant dense<0.000000e+00> : vector<2xf32>
      %379 = vector.multi_reduction <add>, %378, %cst_121 [1] : vector<2x32xf32> to vector<2xf32>
      %380 = vector.shape_cast %379 : vector<2xf32> to vector<2x1xf32>
      %c0_122 = arith.constant 0 : index
      %c0_123 = arith.constant 0 : index
      %381 = vector.load %arg7[%c0_122, %c0_123] : memref<1x1xf32, #tpu.memory_space<vmem>>, vector<1x1xf32>
      %382 = vector.broadcast %381 : vector<1x1xf32> to vector<2x1xf32>
      %383 = arith.addf %380, %382 : vector<2x1xf32>
      %384 = vector.shape_cast %383 : vector<2x1xf32> to vector<2x1xf32>
      %385 = vector.broadcast %384 : vector<2x1xf32> to vector<2x128xf32>
      %c0_124 = arith.constant 0 : index
      %c0_125 = arith.constant 0 : index
      %386 = vector.load %arg8[%c0_124, %c0_125] : memref<2x128xf32, #tpu.memory_space<vmem>>, vector<2x128xf32>
      tpu.vector_store %arg8[%c0_124, %c0_125], %385 {strides = array<i32>} : memref<2x128xf32, #tpu.memory_space<vmem>>, vector<2x128xf32>,
    } else {
    }
    return
  }
  func.func @transform_0(%arg0: i32) -> (i32, i32, i32) {
    %c0_i32 = arith.constant 0 : i32
    %c0_i32_0 = arith.constant 0 : i32
    %c0_i32_1 = arith.constant 0 : i32
    return %arg0, %c0_i32, %c0_i32_0 : i32, i32, i32
  }
  func.func @transform_1(%arg0: i32) -> (i32, i32) {
    %c0_i32 = arith.constant 0 : i32
    %c0_i32_0 = arith.constant 0 : i32
    %c0_i32_1 = arith.constant 0 : i32
    return %c0_i32, %c0_i32_0 : i32, i32
  }
  func.func @transform_2(%arg0: i32) -> (i32, i32) {
    %c0_i32 = arith.constant 0 : i32
    %c0_i32_0 = arith.constant 0 : i32
    %c0_i32_1 = arith.constant 0 : i32
    return %c0_i32, %c0_i32_0 : i32, i32
  }
  func.func @transform_3(%arg0: i32) -> (i32, i32) {
    %c0_i32 = arith.constant 0 : i32
    %c0_i32_0 = arith.constant 0 : i32
    %c0_i32_1 = arith.constant 0 : i32
    return %c0_i32, %c0_i32_0 : i32, i32
  }
  func.func @transform_4(%arg0: i32) -> (i32, i32) {
    %c0_i32 = arith.constant 0 : i32
    %c0_i32_0 = arith.constant 0 : i32
    %c0_i32_1 = arith.constant 0 : i32
    return %c0_i32, %c0_i32_0 : i32, i32
  }
  func.func @transform_5(%arg0: i32) -> (i32, i32) {
    %c0_i32 = arith.constant 0 : i32
    %c0_i32_0 = arith.constant 0 : i32
    %c0_i32_1 = arith.constant 0 : i32
    return %c0_i32, %c0_i32_0 : i32, i32
  }
  func.func @transform_6(%arg0: i32) -> (i32, i32) {
    %c0_i32 = arith.constant 0 : i32
    %c0_i32_0 = arith.constant 0 : i32
    %c0_i32_1 = arith.constant 0 : i32
    return %c0_i32, %c0_i32_0 : i32, i32
  }
  func.func @transform_7(%arg0: i32) -> (i32, i32) {
    %c0_i32 = arith.constant 0 : i32
    %c0_i32_0 = arith.constant 0 : i32
    %c0_i32_1 = arith.constant 0 : i32
    return %c0_i32, %c0_i32_0 : i32, i32
  }
}

</mosaic_0001>

<bundles_post_ra>
// kernel: sequence_forward.1
= control target key start
LH: loop header
LB: loop body
LE: loop exit
PB: predicated region body
PF: predicated region fallthrough
CT: control target
= control target key end

     0   :  { %s3439_s0 = inlined_call_operand.vmem [shape: f32[8,2,128], index: 0, kind: input, shape index: {}]   ;;  %s3440_s1 = inlined_call_operand.vmem [shape: f32[32,128], index: 1, kind: input, shape index: {}]   ;;  %s3441_s2 = inlined_call_operand.vmem [shape: f32[32,128], index: 2, kind: input, shape index: {}]   ;;  %s3442_s3 = inlined_call_operand.hbm [shape: f32[32,128], index: 3, kind: input, shape index: {}]   ;;  %s3443_s4 = inlined_call_operand.vmem [shape: f32[1,128], index: 4, kind: input, shape index: {}]   ;;  %s3444_s5 = inlined_call_operand.hbm [shape: f32[1,32], index: 5, kind: input, shape index: {}]   ;;  %s3445_s6 = inlined_call_operand.<no memory space> [shape: f32[1,1], index: 6, kind: input, shape index: {}]   ;;  %s3446_s7 = inlined_call_operand.vmem [shape: f32[2,128], index: 7, kind: output, shape index: {}]  }
   0x1   :  { %v12_v0 = vstv %s3445_s6 }
   0x2   :  { %13 = vst [vmem:[#allocation3] sm:$0x1] %v12_v0 }
   0x3   :  { %14 = vsyncpa [#allocation5], 0 }
   0x4   :  { %15 = vsyncpa [#allocation7], 0  ;;  %s2882_s26 = smov [#allocation4]  }
   0x5   :  { %s27_s27 = sshll.u32 %s2882_s26, 4  ;;  %s28_s27 = int_to_ptr.vmem [resolvable:$true] %s27_s27 }
   0x6   :  { %s2846_s28 = scalar_lea.vmem %s28_s27, 512  ;;  %p2851_p1 = scmp.lt.s32.totalorder %s28_s27, %s28_s27 }
   0x7   :  { %p2847_p0 = scmp.ne.s32.totalorder %s28_s27, %s2846_s28  ;;  %p2852_p2 = scmp.lt.s32.totalorder %s2846_s28, %s2846_s28 }
   0x9   :  { %p2853_p3 = por %p2852_p2, %p2851_p1 }
   0xb   :  { %p2854_p4 = pnand %p2853_p3, %p2847_p0 }
   0xd   :  { %2857 = shalt.err (!%p2854_p4)
}
   0xe   :  { %s2883_s29 = smov 128   ;;  %s2884_s30 = smov 8  }
   0xf   :  { %33 = dma.hbm_to_vmem [thread:$0]  %s3442_s3, 512, %s28_s27, [#allocation5], %s2883_s29, %s2883_s29, %s2884_s30  }
  0x10   :  { %s2885_s6 = smov [#allocation6]  }
  0x11   :  { %s42_s10 = sshll.u32 %s2885_s6, 4  ;;  %s43_s10 = int_to_ptr.vmem [resolvable:$true] %s42_s10 }
  0x12   :  { %s2866_s11 = scalar_lea.vmem %s43_s10, 16  ;;  %s2870_s12 = scalar_lea.vmem %s43_s10, 32 }
  0x13   :  { %p2867_p5 = scmp.ne.s32.totalorder %s43_s10, %s2866_s11  ;;  %p2871_p6 = scmp.lt.s32.totalorder %s43_s10, %s43_s10 }
  0x14   :  { %p2872_p7 = scmp.lt.s32.totalorder %s2870_s12, %s2866_s11 }
  0x16   :  { %p2873_p8 = por %p2872_p7, %p2871_p6 }
  0x18   :  { %p2874_p9 = pnand %p2873_p8, %p2867_p5 }
  0x1a   :  { %2877 = shalt.err (!%p2874_p9)
}
  0x1b   :  { %45 = dma.hbm_to_vmem [thread:$0]  %s3444_s5, 16, %s43_s10, [#allocation7]  }
  0x1c   :  { %2878 = dma.done.wait [#allocation5], 512  }
  0x1d   :  { %2879 = vsyncadd [#allocation5], 4294966784 }
  0x1e   :  { %2880 = dma.done.wait [#allocation7], 16  }
  0x1f   :  { %2881 = vsyncadd [#allocation7], 4294967280  ;;  %vm58_vm0 = vcmask 254976   ;;  %v2886_v1 = vmov 0.0   ;;  %vm2887_vm1 = vmmov 0   ;;  %v2958_v2 = vld [vmem:[%s3440_s1 + $0x18] sm:$0xff] }
  0x20   :  { %2454 = vmatprep.subr.mxu0 %v2886_v1  ;;  %2462 = vmatprep.mubr.msk.f32.mxu0 %vm2887_vm1, %v2886_v1  ;;  %59 = vst.msk [vmem:[#allocation2] sm:$0x3] %vm58_vm0, %v2886_v1  ;;  %60 = vst.msk [vmem:[#allocation2 + $0x2] sm:$0x3] %vm58_vm0, %v2886_v1  ;;  %v2963_v3 = vld [vmem:[%s3440_s1 + $0x10] sm:$0xff]  ;;  %v2970_v4 = vld [vmem:[%s3440_s1 + $0x8] sm:$0xff] }
  0x21   :  { %61 = vst.msk [vmem:[#allocation2 + $0x4] sm:$0x3] %vm58_vm0, %v2886_v1  ;;  %62 = vst.msk [vmem:[#allocation2 + $0x6] sm:$0x3] %vm58_vm0, %v2886_v1  ;;  %2465 = vmatprep.subr.mxu1 %v2886_v1  ;;  %2473 = vmatprep.mubr.msk.f32.mxu1 %vm2887_vm1, %v2886_v1  ;;  %v2977_v5 = vld [vmem:[%s3440_s1] sm:$0xff]  ;;  %vm90_vm2 = vcmask 261120  }
  0x22   :  { %2455 = vmatpush3.msra.mxu0 %v2958_v2  ;;  %v89_v7 = vld [vmem:[%s3439_s0] sm:$0x3]  ;;  %s2888_s23 = smov 64   ;;  %s2889_s24 = smov 32   ;;  %v3003_v25 = vld [vmem:[%s3441_s2 + $0x18] sm:$0xff]  ;;  %v3012_v27 = vld [vmem:[%s3441_s2 + $0x10] sm:$0xff] }
  0x23   :  { %2456 = vmatprep.subr.mxu0 %v2886_v1  ;;  %v2995_v23 = vld [vmem:[#allocation4 + $0x18] sm:$0xff]  ;;  %v2997_v24 = vld [vmem:[#allocation4 + $0x10] sm:$0xff]  ;;  %v3006_v26 = vld [vmem:[#allocation4 + $0x8] sm:$0xff]  ;;  %s2890_s5 = smov 96  }
  0x24   :  { %2457 = vmatpush3.msra.mxu0 %v2963_v3  ;;  %2466 = vmatpush3.msra.mxu1 %v2995_v23  ;;  %v3019_v28 = vld [vmem:[%s3441_s2 + $0x8] sm:$0xff]  ;;  %v3032_v31 = vld [vmem:[%s3441_s2] sm:$0xff] }
  0x25   :  { %2458 = vmatprep.subr.mxu0 %v2886_v1  ;;  %2467 = vmatprep.subr.mxu1 %v2886_v1  ;;  %v3022_v29 = vld [vmem:[#allocation4] sm:$0xff]  ;;  %v2304_v38 = vld [vmem:[%s3439_s0 + $0x2] sm:$0x3]  ;;  %v3080_v39 = vld [vmem:[%s3443_s4] ss:$0 sm:$0xff] }
  0x26   :  { %2459 = vmatpush3.msra.mxu0 %v2970_v4  ;;  %2468 = vmatpush3.msra.mxu1 %v2997_v24 }
  0x27   :  { %v82_v6 = vld [vmem:[#allocation2] sm:$0x3]  ;;  %2460 = vmatprep.subr.mxu0 %v2886_v1  ;;  %v84_v12 = vld [vmem:[#allocation2 + $0x2] sm:$0x3]  ;;  %2469 = vmatprep.subr.mxu1 %v2886_v1 }
  0x28   :  { %2461 = vmatpush3.msra.mxu0 %v2977_v5  ;;  %2470 = vmatpush3.msra.mxu1 %v3006_v26  ;;  %v86_v30 = vld [vmem:[#allocation2 + $0x4] sm:$0x3]  ;;  %v88_v49 = vld [vmem:[#allocation2 + $0x6] sm:$0x3] }
  0x29   :  { %2463 = vmatmul.mubr.msk.f32.vlgmr.msra.gmra.mxu0 %vm90_vm2, %v82_v6  ;;  %2476 = vmatprep.subr.mxu0 %v2886_v1 }
  0x2a   :  { %2484 = vmatprep.mubr.msk.f32.mxu0 %vm2887_vm1, %v2886_v1  ;;  %2477 = vmatpush3.msra.mxu0 %v3003_v25 }
  0x2b   :  { %2478 = vmatprep.subr.mxu0 %v2886_v1  ;;  %2471 = vmatprep.subr.mxu1 %v2886_v1 }
  0x2c   :  { %2479 = vmatpush3.msra.mxu0 %v3012_v27  ;;  %2472 = vmatpush3.msra.mxu1 %v3022_v29 }
  0x2d   :  { %2480 = vmatprep.subr.mxu0 %v2886_v1  ;;  %2487 = vmatprep.subr.mxu1 %v2886_v1 }
  0x2e   :  { %2481 = vmatpush3.msra.mxu0 %v3019_v28  ;;  %2474 = vmatmul.mubr.msk.f32.vlgmr.msra.gmra.mxu1 %vm90_vm2, %v86_v30 }
  0x2f   :  { %2482 = vmatprep.subr.mxu0 %v2886_v1  ;;  %2488 = vmatpush3.msra.mxu1 %v2958_v2 }
  0x30   :  { %2483 = vmatpush3.msra.mxu0 %v3032_v31  ;;  %2489 = vmatprep.subr.mxu1 %v2886_v1 }
  0x31   :  { %2495 = vmatprep.mubr.msk.f32.mxu1 %vm2887_vm1, %v2886_v1  ;;  %2490 = vmatpush3.msra.mxu1 %v2963_v3 }
  0x32   :  { %2491 = vmatprep.subr.mxu1 %v2886_v1  ;;  %2498 = vmatprep.subr.mxu0 %v2886_v1 }
  0x33   :  { %2492 = vmatpush3.msra.mxu1 %v2970_v4 }
  0x34   :  { %2493 = vmatprep.subr.mxu1 %v2886_v1 }
  0x35   :  { %2494 = vmatpush3.msra.mxu1 %v2977_v5 }
  0x36   :  { %2509 = vmatprep.subr.mxu1 %v2886_v1 }
  0xe9   :  { %v160_v8 = vpop.f32.mrf.mxu0 }
  0xea   :  { %v164_v9 = vadd.f32 %v160_v8, %v89_v7 }
  0xeb   :  { %v2464_v10 = vpop.f32.mrf.mxu0 }
  0xec   :  { %2729 = vtanh.f32 %v164_v9  ;;  %v165_v13 = vmul.f32 0.5, %v164_v9 }
  0xee   :  { %2731 = vtanh.f32 %v165_v13  ;;  %v260_v35 = vpop.f32.mrf.mxu1 }
  0xf0   :  { %v2475_v36 = vpop.f32.mrf.mxu1 }
  0xf9   :  { %v2730_v11 = vpop.eup %2729 }
  0xfa   :  { %176 = vrot.lane.b32.xlu0 %v2730_v11, %s2888_s23 }
  0xfb   :  { %v2732_v14 = vpop.eup %2731 }
  0xfc   :  { %v167_v15 = vmul.f32 0.5, %v2732_v14 }
  0xfe   :  { %171 = vrot.lane.b32.xlu0 %v84_v12, %s2889_s24  ;;  %v168_v16 = vadd.f32 0.5, %v167_v15 }
 0x16c   :  { %v177_v17 = vpop.permute.xlu0 %176 }
 0x16d   :  { %v179_v18 = vmul.f32 %v177_v17, %v168_v16 }
 0x16f   :  { %181 = vrot.lane.b32.xlu1 %v179_v18, %s2889_s24 }
 0x170   :  { %v172_v19 = vpop.permute.xlu0 %171 }
 0x171   :  { %v174_v20 = vmul.f32 %v172_v19, %v168_v16 }
 0x1e1   :  { %v182_v21 = vpop.permute.xlu1 %181 }
 0x1e2   :  { %v2992_v22 = vadd.f32 %v182_v21, %v174_v20 }
 0x1e4   :  { %2733 = vtanh.f32 %v2992_v22 }
 0x1f1   :  { %v2734_v32 = vpop.eup %2733 }
 0x1f2   :  { %187 = vrot.lane.b32.xlu1 %v2734_v32, %s2888_s23  ;;  %v2308_v32 = vld [vmem:[%s3439_s0 + $0x4] sm:$0x3] }
 0x264   :  { %v188_v33 = vpop.permute.xlu1 %187 }
 0x265   :  { %v190_v34 = vmul.f32 %v188_v33, %v168_v16 }
 0x267   :  { %265 = vrot.lane.b32.xlu0 %v190_v34, %s2889_s24 }
 0x2d9   :  { %v266_v37 = vpop.permute.xlu0 %265 }
 0x2da   :  { %2485 = vmatmul.mubr.msk.f32.vlgmr.msra.gmra.mxu0 %vm90_vm2, %v266_v37  ;;  %2496 = vmatmul.mubr.msk.f32.vlgmr.msra.gmra.mxu1 %vm90_vm2, %v266_v37 }
 0x2db   :  { %2510 = vmatpush3.msra.mxu1 %v3003_v25  ;;  %2499 = vmatpush3.msra.mxu0 %v2995_v23 }
 0x2dc   :  { %2511 = vmatprep.subr.mxu1 %v2886_v1  ;;  %2500 = vmatprep.subr.mxu0 %v2886_v1 }
 0x2dd   :  { %2512 = vmatpush3.msra.mxu1 %v3012_v27  ;;  %2501 = vmatpush3.msra.mxu0 %v2997_v24 }
 0x2de   :  { %2513 = vmatprep.subr.mxu1 %v2886_v1  ;;  %2502 = vmatprep.subr.mxu0 %v2886_v1 }
 0x2df   :  { %2514 = vmatpush3.msra.mxu1 %v3019_v28  ;;  %2503 = vmatpush3.msra.mxu0 %v3006_v26 }
 0x2e0   :  { %2515 = vmatprep.subr.mxu1 %v2886_v1  ;;  %2504 = vmatprep.subr.mxu0 %v2886_v1 }
 0x2e1   :  { %2516 = vmatpush3.msra.mxu1 %v3032_v31  ;;  %2517 = vmatprep.mubr.msk.f32.mxu1 %vm2887_vm1, %v2886_v1 }
 0x2e2   :  { %2505 = vmatpush3.msra.mxu0 %v3022_v29  ;;  %2506 = vmatprep.mubr.msk.f32.mxu0 %vm2887_vm1, %v2886_v1 }
 0x2e3   :  { %2520 = vmatprep.subr.mxu0 %v2886_v1  ;;  %2531 = vmatprep.subr.mxu1 %v2886_v1 }
 0x39a   :  { %v335_v40 = vpop.f32.mrf.mxu0  ;;  %v434_v41 = vpop.f32.mrf.mxu1 }
 0x39b   :  { %v336_v42 = vadd.f32 %v335_v40, %v260_v35  ;;  %v438_v43 = vadd.f32 %v2304_v38, %v434_v41 }
 0x39c   :  { %v2486_v44 = vpop.f32.mrf.mxu0  ;;  %v2497_v45 = vpop.f32.mrf.mxu1 }
 0x39d   :  { %v339_v46 = vadd.f32 %v3080_v39, %v336_v42  ;;  %2735 = vtanh.f32 %v438_v43  ;;  %v439_v50 = vmul.f32 0.5, %v438_v43 }
 0x39f   :  { %2737 = vtanh.f32 %v339_v46  ;;  %v340_v51 = vmul.f32 0.5, %v339_v46 }
 0x3a0   :  { %2739 = vtanh.f32 %v439_v50 }
 0x3a1   :  { %2741 = vtanh.f32 %v340_v51 }
 0x3aa   :  { %v2736_v47 = vpop.eup %2735 }
 0x3ab   :  { %446 = vrot.lane.b32.xlu0 %v2736_v47, %s2888_s23 }
 0x3ac   :  { %v2738_v48 = vpop.eup %2737 }
 0x3ad   :  { %351 = vrot.lane.b32.xlu1 %v2738_v48, %s2888_s23  ;;  %v2740_v52 = vpop.eup %2739 }
 0x3ae   :  { %v2742_v53 = vpop.eup %2741  ;;  %v441_v54 = vmul.f32 0.5, %v2740_v52 }
 0x3af   :  { %v342_v55 = vmul.f32 0.5, %v2742_v53 }
 0x3b0   :  { %v442_v56 = vadd.f32 0.5, %v441_v54 }
 0x3b1   :  { %346 = vrot.lane.b32.xlu1 %v88_v49, %s2889_s24  ;;  %v343_v59 = vadd.f32 0.5, %v342_v55 }
 0x3b2   :  { %v444_v63 = vmul.f32 %v442_v56, %v2992_v22 }
 0x41d   :  { %v447_v57 = vpop.permute.xlu0 %446 }
 0x41e   :  { %v449_v58 = vmul.f32 %v447_v57, %v442_v56 }
 0x41f   :  { %v352_v60 = vpop.permute.xlu1 %351 }
 0x420   :  { %v354_v61 = vmul.f32 %v352_v60, %v343_v59  ;;  %451 = vrot.lane.b32.xlu1 %v449_v58, %s2889_s24 }
 0x422   :  { %356 = vrot.lane.b32.xlu0 %v354_v61, %s2889_s24 }
 0x423   :  { %v347_v62 = vpop.permute.xlu1 %346 }
 0x424   :  { %v349_v6 = vmul.f32 %v347_v62, %v343_v59 }
 0x492   :  { %v452_v0 = vpop.permute.xlu1 %451 }
 0x493   :  { %v3089_v7 = vadd.f32 %v452_v0, %v444_v63 }
 0x494   :  { %v357_v8 = vpop.permute.xlu0 %356 }
 0x495   :  { %2743 = vtanh.f32 %v3089_v7  ;;  %v3092_v9 = vadd.f32 %v357_v8, %v349_v6 }
 0x497   :  { %2745 = vtanh.f32 %v3092_v9 }
 0x4a2   :  { %v2744_v10 = vpop.eup %2743 }
 0x4a3   :  { %457 = vrot.lane.b32.xlu1 %v2744_v10, %s2888_s23 }
 0x4a4   :  { %v2746_v11 = vpop.eup %2745 }
 0x4a5   :  { %362 = vrot.lane.b32.xlu0 %v2746_v11, %s2888_s23 }
 0x515   :  { %v458_v12 = vpop.permute.xlu1 %457 }
 0x516   :  { %v460_v13 = vmul.f32 %v458_v12, %v442_v56 }
 0x517   :  { %v363_v14 = vpop.permute.xlu0 %362 }
 0x518   :  { %v365_v15 = vmul.f32 %v363_v14, %v343_v59  ;;  %537 = vrot.lane.b32.xlu1 %v460_v13, %s2889_s24 }
 0x51a   :  { %462 = vrot.lane.b32.xlu0 %v365_v15, %s2889_s24 }
 0x58a   :  { %v538_v16 = vpop.permute.xlu1 %537 }
 0x58b   :  { %2518 = vmatmul.mubr.msk.f32.vlgmr.msra.gmra.mxu1 %vm90_vm2, %v538_v16 }
 0x58c   :  { %v463_v17 = vpop.permute.xlu0 %462  ;;  %2532 = vmatpush3.msra.mxu1 %v2995_v23  ;;  %2539 = vmatprep.mubr.msk.f32.mxu1 %vm2887_vm1, %v2886_v1 }
 0x58d   :  { %2507 = vmatmul.mubr.msk.f32.vlgmr.msra.gmra.mxu0 %vm90_vm2, %v463_v17  ;;  %2533 = vmatprep.subr.mxu1 %v2886_v1 }
 0x58e   :  { %2521 = vmatpush3.msra.mxu0 %v2958_v2  ;;  %2528 = vmatprep.mubr.msk.f32.mxu0 %vm2887_vm1, %v2886_v1 }
 0x58f   :  { %2522 = vmatprep.subr.mxu0 %v2886_v1  ;;  %2534 = vmatpush3.msra.mxu1 %v2997_v24 }
 0x590   :  { %2523 = vmatpush3.msra.mxu0 %v2963_v3  ;;  %2535 = vmatprep.subr.mxu1 %v2886_v1 }
 0x591   :  { %2524 = vmatprep.subr.mxu0 %v2886_v1  ;;  %2536 = vmatpush3.msra.mxu1 %v3006_v26 }
 0x592   :  { %2525 = vmatpush3.msra.mxu0 %v2970_v4  ;;  %2537 = vmatprep.subr.mxu1 %v2886_v1 }
 0x593   :  { %2526 = vmatprep.subr.mxu0 %v2886_v1  ;;  %2538 = vmatpush3.msra.mxu1 %v3022_v29 }
 0x594   :  { %2527 = vmatpush3.msra.mxu0 %v2977_v5  ;;  %2553 = vmatprep.subr.mxu1 %v2886_v1 }
 0x595   :  { %2529 = vmatmul.mubr.msk.f32.vlgmr.msra.gmra.mxu0 %vm90_vm2, %v538_v16  ;;  %2542 = vmatprep.subr.mxu0 %v2886_v1 }
 0x596   :  { %2543 = vmatpush3.msra.mxu0 %v3003_v25  ;;  %2550 = vmatprep.mubr.msk.f32.mxu0 %vm2887_vm1, %v2886_v1 }
 0x597   :  { %2544 = vmatprep.subr.mxu0 %v2886_v1 }
 0x598   :  { %2545 = vmatpush3.msra.mxu0 %v3012_v27 }
 0x599   :  { %2546 = vmatprep.subr.mxu0 %v2886_v1 }
 0x59a   :  { %2547 = vmatpush3.msra.mxu0 %v3019_v28 }
 0x59b   :  { %2548 = vmatprep.subr.mxu0 %v2886_v1 }
 0x59c   :  { %2549 = vmatpush3.msra.mxu0 %v3032_v31 }
 0x59d   :  { %2564 = vmatprep.subr.mxu0 %v2886_v1 }
 0x64b   :  { %v607_v18 = vpop.f32.mrf.mxu1 }
 0x64d   :  { %v532_v19 = vpop.f32.mrf.mxu0  ;;  %v2519_v20 = vpop.f32.mrf.mxu1 }
 0x64e   :  { %v608_v21 = vadd.f32 %v607_v18, %v532_v19 }
 0x64f   :  { %v2508_v22 = vpop.f32.mrf.mxu0 }
 0x650   :  { %v611_v30 = vadd.f32 %v3080_v39, %v608_v21 }
 0x652   :  { %2747 = vtanh.f32 %v611_v30  ;;  %v612_v38 = vmul.f32 0.5, %v611_v30 }
 0x655   :  { %v702_v33 = vpop.f32.mrf.mxu0 }
 0x656   :  { %v706_v34 = vadd.f32 %v2308_v32, %v702_v33 }
 0x657   :  { %v2530_v35 = vpop.f32.mrf.mxu0 }
 0x658   :  { %2749 = vtanh.f32 %v706_v34  ;;  %v707_v40 = vmul.f32 0.5, %v706_v34 }
 0x659   :  { %2751 = vtanh.f32 %v612_v38 }
 0x65a   :  { %2753 = vtanh.f32 %v707_v40 }
 0x65f   :  { %v2748_v36 = vpop.eup %2747 }
 0x660   :  { %619 = vrot.lane.b32.xlu0 %v2748_v36, %s2888_s23 }
 0x665   :  { %v2750_v37 = vpop.eup %2749 }
 0x666   :  { %714 = vrot.lane.b32.xlu1 %v2750_v37, %s2888_s23  ;;  %v2752_v41 = vpop.eup %2751 }
 0x667   :  { %v614_v42 = vmul.f32 0.5, %v2752_v41  ;;  %v2754_v43 = vpop.eup %2753 }
 0x668   :  { %v709_v47 = vmul.f32 0.5, %v2754_v43 }
 0x669   :  { %v615_v44 = vadd.f32 0.5, %v614_v42 }
 0x66a   :  { %v710_v48 = vadd.f32 0.5, %v709_v47 }
 0x66b   :  { %v617_v51 = vmul.f32 %v615_v44, %v3092_v9  ;;  %v2312_v9 = vld [vmem:[%s3439_s0 + $0x6] sm:$0x3] }
 0x66c   :  { %v712_v54 = vmul.f32 %v710_v48, %v3089_v7 }
 0x6d2   :  { %v620_v45 = vpop.permute.xlu0 %619 }
 0x6d3   :  { %v622_v46 = vmul.f32 %v620_v45, %v615_v44 }
 0x6d5   :  { %624 = vrot.lane.b32.xlu0 %v622_v46, %s2889_s24 }
 0x6d8   :  { %v715_v49 = vpop.permute.xlu1 %714 }
 0x6d9   :  { %v717_v50 = vmul.f32 %v715_v49, %v710_v48 }
 0x6db   :  { %719 = vrot.lane.b32.xlu1 %v717_v50, %s2889_s24 }
 0x747   :  { %v625_v52 = vpop.permute.xlu0 %624 }
 0x748   :  { %v3141_v53 = vadd.f32 %v625_v52, %v617_v51 }
 0x74a   :  { %2755 = vtanh.f32 %v3141_v53 }
 0x74d   :  { %v720_v55 = vpop.permute.xlu1 %719 }
 0x74e   :  { %v3145_v56 = vadd.f32 %v720_v55, %v712_v54 }
 0x750   :  { %2757 = vtanh.f32 %v3145_v56 }
 0x757   :  { %v2756_v57 = vpop.eup %2755 }
 0x758   :  { %630 = vrot.lane.b32.xlu0 %v2756_v57, %s2888_s23 }
 0x75d   :  { %v2758_v58 = vpop.eup %2757 }
 0x75e   :  { %725 = vrot.lane.b32.xlu1 %v2758_v58, %s2888_s23 }
 0x7ca   :  { %v631_v59 = vpop.permute.xlu0 %630 }
 0x7cb   :  { %v633_v60 = vmul.f32 %v631_v59, %v615_v44  ;;  %v2316_v59 = vld [vmem:[%s3439_s0 + $0x8] sm:$0x3] }
 0x7cd   :  { %730 = vrot.lane.b32.xlu0 %v633_v60, %s2889_s24 }
 0x7d0   :  { %v726_v61 = vpop.permute.xlu1 %725 }
 0x7d1   :  { %v728_v62 = vmul.f32 %v726_v61, %v710_v48 }
 0x7d3   :  { %805 = vrot.lane.b32.xlu1 %v728_v62, %s2889_s24 }
 0x83f   :  { %v731_v63 = vpop.permute.xlu0 %730 }
 0x840   :  { %2540 = vmatmul.mubr.msk.f32.vlgmr.msra.gmra.mxu1 %vm90_vm2, %v731_v63 }
 0x841   :  { %2554 = vmatpush3.msra.mxu1 %v2958_v2  ;;  %2561 = vmatprep.mubr.msk.f32.mxu1 %vm2887_vm1, %v2886_v1 }
 0x842   :  { %2555 = vmatprep.subr.mxu1 %v2886_v1 }
 0x843   :  { %2556 = vmatpush3.msra.mxu1 %v2963_v3 }
 0x844   :  { %2557 = vmatprep.subr.mxu1 %v2886_v1 }
 0x845   :  { %2558 = vmatpush3.msra.mxu1 %v2970_v4  ;;  %v806_v0 = vpop.permute.xlu1 %805 }
 0x846   :  { %2551 = vmatmul.mubr.msk.f32.vlgmr.msra.gmra.mxu0 %vm90_vm2, %v806_v0  ;;  %2559 = vmatprep.subr.mxu1 %v2886_v1 }
 0x847   :  { %2560 = vmatpush3.msra.mxu1 %v2977_v5  ;;  %2565 = vmatpush3.msra.mxu0 %v2995_v23 }
 0x848   :  { %2562 = vmatmul.mubr.msk.f32.vlgmr.msra.gmra.mxu1 %vm90_vm2, %v806_v0  ;;  %2575 = vmatprep.subr.mxu1 %v2886_v1 }
 0x849   :  { %2566 = vmatprep.subr.mxu0 %v2886_v1  ;;  %2576 = vmatpush3.msra.mxu1 %v3003_v25 }
 0x84a   :  { %2567 = vmatpush3.msra.mxu0 %v2997_v24  ;;  %2577 = vmatprep.subr.mxu1 %v2886_v1 }
 0x84b   :  { %2568 = vmatprep.subr.mxu0 %v2886_v1  ;;  %2578 = vmatpush3.msra.mxu1 %v3012_v27 }
 0x84c   :  { %2569 = vmatpush3.msra.mxu0 %v3006_v26  ;;  %2579 = vmatprep.subr.mxu1 %v2886_v1 }
 0x84d   :  { %2570 = vmatprep.subr.mxu0 %v2886_v1  ;;  %2580 = vmatpush3.msra.mxu1 %v3019_v28 }
 0x84e   :  { %2571 = vmatpush3.msra.mxu0 %v3022_v29  ;;  %2581 = vmatprep.subr.mxu1 %v2886_v1 }
 0x84f   :  { %2582 = vmatpush3.msra.mxu1 %v3032_v31  ;;  %2583 = vmatprep.mubr.msk.f32.mxu1 %vm2887_vm1, %v2886_v1 }
 0x850   :  { %2572 = vmatprep.mubr.msk.f32.mxu0 %vm2887_vm1, %v2886_v1  ;;  %2586 = vmatprep.subr.mxu0 %v2886_v1 }
 0x851   :  { %2597 = vmatprep.subr.mxu1 %v2886_v1 }
 0x900   :  { %v800_v6 = vpop.f32.mrf.mxu1 }
 0x902   :  { %v2541_v7 = vpop.f32.mrf.mxu1 }
 0x906   :  { %v875_v8 = vpop.f32.mrf.mxu0 }
 0x907   :  { %v876_v10 = vadd.f32 %v875_v8, %v800_v6 }
 0x908   :  { %v2552_v11 = vpop.f32.mrf.mxu0  ;;  %v970_v12 = vpop.f32.mrf.mxu1 }
 0x909   :  { %v879_v13 = vadd.f32 %v3080_v39, %v876_v10  ;;  %v974_v14 = vadd.f32 %v2312_v9, %v970_v12 }
 0x90a   :  { %v2563_v15 = vpop.f32.mrf.mxu1 }
 0x90b   :  { %2759 = vtanh.f32 %v879_v13  ;;  %v880_v18 = vmul.f32 0.5, %v879_v13  ;;  %v975_v19 = vmul.f32 0.5, %v974_v14 }
 0x90c   :  { %2761 = vtanh.f32 %v974_v14 }
 0x90d   :  { %2763 = vtanh.f32 %v880_v18 }
 0x90e   :  { %2765 = vtanh.f32 %v975_v19 }
 0x918   :  { %v2760_v16 = vpop.eup %2759 }
 0x919   :  { %v2762_v17 = vpop.eup %2761  ;;  %887 = vrot.lane.b32.xlu0 %v2760_v16, %s2888_s23 }
 0x91a   :  { %982 = vrot.lane.b32.xlu1 %v2762_v17, %s2888_s23  ;;  %v2764_v20 = vpop.eup %2763 }
 0x91b   :  { %v2766_v21 = vpop.eup %2765  ;;  %v882_v22 = vmul.f32 0.5, %v2764_v20 }
 0x91c   :  { %v977_v30 = vmul.f32 0.5, %v2766_v21 }
 0x91d   :  { %v883_v32 = vadd.f32 0.5, %v882_v22 }
 0x91e   :  { %v978_v33 = vadd.f32 0.5, %v977_v30 }
 0x91f   :  { %v885_v38 = vmul.f32 %v883_v32, %v3141_v53 }
 0x920   :  { %v980_v40 = vmul.f32 %v978_v33, %v3145_v56 }
 0x98b   :  { %v888_v34 = vpop.permute.xlu0 %887 }
 0x98c   :  { %v983_v35 = vpop.permute.xlu1 %982  ;;  %v890_v36 = vmul.f32 %v888_v34, %v883_v32 }
 0x98d   :  { %v985_v37 = vmul.f32 %v983_v35, %v978_v33 }
 0x98e   :  { %892 = vrot.lane.b32.xlu0 %v890_v36, %s2889_s24 }
 0x98f   :  { %987 = vrot.lane.b32.xlu1 %v985_v37, %s2889_s24 }
 0xa00   :  { %v893_v41 = vpop.permute.xlu0 %892 }
 0xa01   :  { %v988_v42 = vpop.permute.xlu1 %987  ;;  %v3195_v43 = vadd.f32 %v893_v41, %v885_v38 }
 0xa02   :  { %v3197_v44 = vadd.f32 %v988_v42, %v980_v40 }
 0xa03   :  { %2767 = vtanh.f32 %v3195_v43 }
 0xa04   :  { %2769 = vtanh.f32 %v3197_v44 }
 0xa10   :  { %v2768_v45 = vpop.eup %2767 }
 0xa11   :  { %v2770_v46 = vpop.eup %2769  ;;  %898 = vrot.lane.b32.xlu0 %v2768_v45, %s2888_s23  ;;  %v2320_v45 = vld [vmem:[%s3439_s0 + $0xa] sm:$0x3] }
 0xa12   :  { %993 = vrot.lane.b32.xlu1 %v2770_v46, %s2888_s23 }
 0xa83   :  { %v899_v47 = vpop.permute.xlu0 %898 }
 0xa84   :  { %v994_v48 = vpop.permute.xlu1 %993  ;;  %v901_v49 = vmul.f32 %v899_v47, %v883_v32 }
 0xa85   :  { %v996_v50 = vmul.f32 %v994_v48, %v978_v33 }
 0xa86   :  { %998 = vrot.lane.b32.xlu0 %v901_v49, %s2889_s24 }
 0xa87   :  { %1073 = vrot.lane.b32.xlu1 %v996_v50, %s2889_s24 }
 0xaf8   :  { %v999_v51 = vpop.permute.xlu0 %998 }
 0xaf9   :  { %v1074_v52 = vpop.permute.xlu1 %1073  ;;  %2573 = vmatmul.mubr.msk.f32.vlgmr.msra.gmra.mxu0 %vm90_vm2, %v999_v51 }
 0xafa   :  { %2584 = vmatmul.mubr.msk.f32.vlgmr.msra.gmra.mxu1 %vm90_vm2, %v1074_v52  ;;  %2587 = vmatpush3.msra.mxu0 %v2958_v2 }
 0xafb   :  { %2588 = vmatprep.subr.mxu0 %v2886_v1  ;;  %2594 = vmatprep.mubr.msk.f32.mxu0 %vm2887_vm1, %v2886_v1 }
 0xafc   :  { %2589 = vmatpush3.msra.mxu0 %v2963_v3  ;;  %2598 = vmatpush3.msra.mxu1 %v2995_v23 }
 0xafd   :  { %2590 = vmatprep.subr.mxu0 %v2886_v1  ;;  %2599 = vmatprep.subr.mxu1 %v2886_v1 }
 0xafe   :  { %2591 = vmatpush3.msra.mxu0 %v2970_v4  ;;  %2600 = vmatpush3.msra.mxu1 %v2997_v24 }
 0xaff   :  { %2592 = vmatprep.subr.mxu0 %v2886_v1  ;;  %2601 = vmatprep.subr.mxu1 %v2886_v1 }
 0xb00   :  { %2593 = vmatpush3.msra.mxu0 %v2977_v5  ;;  %2602 = vmatpush3.msra.mxu1 %v3006_v26 }
 0xb01   :  { %2595 = vmatmul.mubr.msk.f32.vlgmr.msra.gmra.mxu0 %vm90_vm2, %v1074_v52  ;;  %2603 = vmatprep.subr.mxu1 %v2886_v1 }
 0xb02   :  { %2608 = vmatprep.subr.mxu0 %v2886_v1  ;;  %2604 = vmatpush3.msra.mxu1 %v3022_v29 }
 0xb03   :  { %2609 = vmatpush3.msra.mxu0 %v3003_v25  ;;  %2605 = vmatprep.mubr.msk.f32.mxu1 %vm2887_vm1, %v2886_v1 }
 0xb04   :  { %2610 = vmatprep.subr.mxu0 %v2886_v1  ;;  %2619 = vmatprep.subr.mxu1 %v2886_v1 }
 0xb05   :  { %2611 = vmatpush3.msra.mxu0 %v3012_v27  ;;  %2616 = vmatprep.mubr.msk.f32.mxu0 %vm2887_vm1, %v2886_v1 }
 0xb06   :  { %2612 = vmatprep.subr.mxu0 %v2886_v1 }
 0xb07   :  { %2613 = vmatpush3.msra.mxu0 %v3019_v28 }
 0xb08   :  { %2614 = vmatprep.subr.mxu0 %v2886_v1 }
 0xb09   :  { %2615 = vmatpush3.msra.mxu0 %v3032_v31 }
 0xb0a   :  { %2630 = vmatprep.subr.mxu0 %v2886_v1 }
 0xbb9   :  { %v1068_v53 = vpop.f32.mrf.mxu0 }
 0xbba   :  { %v1143_v54 = vpop.f32.mrf.mxu1 }
 0xbbb   :  { %v1144_v55 = vadd.f32 %v1143_v54, %v1068_v53  ;;  %v2574_v56 = vpop.f32.mrf.mxu0 }
 0xbbc   :  { %v2585_v57 = vpop.f32.mrf.mxu1 }
 0xbbd   :  { %v1147_v58 = vadd.f32 %v3080_v39, %v1144_v55 }
 0xbbf   :  { %2771 = vtanh.f32 %v1147_v58  ;;  %v1148_v6 = vmul.f32 0.5, %v1147_v58 }
 0xbc1   :  { %v1238_v60 = vpop.f32.mrf.mxu0 }
 0xbc2   :  { %v1242_v61 = vadd.f32 %v2316_v59, %v1238_v60 }
 0xbc3   :  { %v2596_v62 = vpop.f32.mrf.mxu0 }
 0xbc4   :  { %2773 = vtanh.f32 %v1242_v61  ;;  %v1243_v7 = vmul.f32 0.5, %v1242_v61 }
 0xbc5   :  { %2775 = vtanh.f32 %v1148_v6 }
 0xbc6   :  { %2777 = vtanh.f32 %v1243_v7 }
 0xbcc   :  { %v2772_v63 = vpop.eup %2771 }
 0xbcd   :  { %1155 = vrot.lane.b32.xlu0 %v2772_v63, %s2888_s23 }
 0xbd1   :  { %v2774_v0 = vpop.eup %2773 }
 0xbd2   :  { %1250 = vrot.lane.b32.xlu1 %v2774_v0, %s2888_s23  ;;  %v2776_v8 = vpop.eup %2775 }
 0xbd3   :  { %v1150_v9 = vmul.f32 0.5, %v2776_v8  ;;  %v2778_v10 = vpop.eup %2777 }
 0xbd4   :  { %v1245_v13 = vmul.f32 0.5, %v2778_v10 }
 0xbd5   :  { %v1151_v11 = vadd.f32 0.5, %v1150_v9 }
 0xbd6   :  { %v1246_v15 = vadd.f32 0.5, %v1245_v13 }
 0xbd7   :  { %v1153_v18 = vmul.f32 %v1151_v11, %v3195_v43 }
 0xbd8   :  { %v1248_v21 = vmul.f32 %v1246_v15, %v3197_v44 }
 0xc3f   :  { %v1156_v12 = vpop.permute.xlu0 %1155 }
 0xc40   :  { %v1158_v14 = vmul.f32 %v1156_v12, %v1151_v11 }
 0xc42   :  { %1160 = vrot.lane.b32.xlu0 %v1158_v14, %s2889_s24 }
 0xc44   :  { %v1251_v16 = vpop.permute.xlu1 %1250 }
 0xc45   :  { %v1253_v17 = vmul.f32 %v1251_v16, %v1246_v15 }
 0xc47   :  { %1255 = vrot.lane.b32.xlu1 %v1253_v17, %s2889_s24 }
 0xcb4   :  { %v1161_v19 = vpop.permute.xlu0 %1160 }
 0xcb5   :  { %v3247_v20 = vadd.f32 %v1161_v19, %v1153_v18 }
 0xcb7   :  { %2779 = vtanh.f32 %v3247_v20 }
 0xcb9   :  { %v1256_v22 = vpop.permute.xlu1 %1255 }
 0xcba   :  { %v3251_v30 = vadd.f32 %v1256_v22, %v1248_v21 }
 0xcbc   :  { %2781 = vtanh.f32 %v3251_v30 }
 0xcc4   :  { %v2780_v32 = vpop.eup %2779 }
 0xcc5   :  { %1166 = vrot.lane.b32.xlu0 %v2780_v32, %s2888_s23 }
 0xcc9   :  { %v2782_v33 = vpop.eup %2781 }
 0xcca   :  { %1261 = vrot.lane.b32.xlu1 %v2782_v33, %s2888_s23 }
 0xd37   :  { %v1167_v34 = vpop.permute.xlu0 %1166 }
 0xd38   :  { %v1169_v35 = vmul.f32 %v1167_v34, %v1151_v11 }
 0xd3a   :  { %1266 = vrot.lane.b32.xlu0 %v1169_v35, %s2889_s24 }
 0xd3c   :  { %v1262_v36 = vpop.permute.xlu1 %1261 }
 0xd3d   :  { %v1264_v37 = vmul.f32 %v1262_v36, %v1246_v15 }
 0xd3f   :  { %1341 = vrot.lane.b32.xlu1 %v1264_v37, %s2889_s24 }
 0xdac   :  { %v1267_v38 = vpop.permute.xlu0 %1266 }
 0xdad   :  { %2606 = vmatmul.mubr.msk.f32.vlgmr.msra.gmra.mxu1 %vm90_vm2, %v1267_v38 }
 0xdae   :  { %2620 = vmatpush3.msra.mxu1 %v2958_v2  ;;  %2627 = vmatprep.mubr.msk.f32.mxu1 %vm2887_vm1, %v2886_v1 }
 0xdaf   :  { %2621 = vmatprep.subr.mxu1 %v2886_v1 }
 0xdb0   :  { %2622 = vmatpush3.msra.mxu1 %v2963_v3 }
 0xdb1   :  { %2623 = vmatprep.subr.mxu1 %v2886_v1  ;;  %v1342_v40 = vpop.permute.xlu1 %1341 }
 0xdb2   :  { %2624 = vmatpush3.msra.mxu1 %v2970_v4  ;;  %2617 = vmatmul.mubr.msk.f32.vlgmr.msra.gmra.mxu0 %vm90_vm2, %v1342_v40 }
 0xdb3   :  { %2625 = vmatprep.subr.mxu1 %v2886_v1  ;;  %2631 = vmatpush3.msra.mxu0 %v2995_v23 }
 0xdb4   :  { %2626 = vmatpush3.msra.mxu1 %v2977_v5  ;;  %2632 = vmatprep.subr.mxu0 %v2886_v1 }
 0xdb5   :  { %2628 = vmatmul.mubr.msk.f32.vlgmr.msra.gmra.mxu1 %vm90_vm2, %v1342_v40  ;;  %2641 = vmatprep.subr.mxu1 %v2886_v1 }
 0xdb6   :  { %2642 = vmatpush3.msra.mxu1 %v3003_v25  ;;  %2633 = vmatpush3.msra.mxu0 %v2997_v24 }
 0xdb7   :  { %2643 = vmatprep.subr.mxu1 %v2886_v1  ;;  %2634 = vmatprep.subr.mxu0 %v2886_v1 }
 0xdb8   :  { %2644 = vmatpush3.msra.mxu1 %v3012_v27  ;;  %2635 = vmatpush3.msra.mxu0 %v3006_v26 }
 0xdb9   :  { %2645 = vmatprep.subr.mxu1 %v2886_v1  ;;  %2636 = vmatprep.subr.mxu0 %v2886_v1 }
 0xdba   :  { %2646 = vmatpush3.msra.mxu1 %v3019_v28  ;;  %2637 = vmatpush3.msra.mxu0 %v3022_v29 }
 0xdbb   :  { %2647 = vmatprep.subr.mxu1 %v2886_v1  ;;  %2649 = vmatprep.mubr.msk.f32.mxu1 %vm2887_vm1, %v2886_v1 }
 0xdbc   :  { %2648 = vmatpush3.msra.mxu1 %v3032_v31  ;;  %2638 = vmatprep.mubr.msk.f32.mxu0 %vm2887_vm1, %v2886_v1 }
 0xdbd   :  { %2652 = vmatprep.subr.mxu0 %v2886_v1  ;;  %2663 = vmatprep.subr.mxu1 %v2886_v1 }
 0xe6d   :  { %v1336_v41 = vpop.f32.mrf.mxu1 }
 0xe6f   :  { %v2607_v42 = vpop.f32.mrf.mxu1 }
 0xe72   :  { %v1411_v43 = vpop.f32.mrf.mxu0 }
 0xe73   :  { %v1412_v44 = vadd.f32 %v1411_v43, %v1336_v41 }
 0xe74   :  { %v2618_v46 = vpop.f32.mrf.mxu0 }
 0xe75   :  { %v1415_v47 = vadd.f32 %v3080_v39, %v1412_v44  ;;  %v1506_v48 = vpop.f32.mrf.mxu1 }
 0xe76   :  { %v1510_v49 = vadd.f32 %v2320_v45, %v1506_v48 }
 0xe77   :  { %2783 = vtanh.f32 %v1415_v47  ;;  %v2629_v50 = vpop.f32.mrf.mxu1  ;;  %v1416_v53 = vmul.f32 0.5, %v1415_v47 }
 0xe78   :  { %2785 = vtanh.f32 %v1510_v49  ;;  %v1511_v54 = vmul.f32 0.5, %v1510_v49 }
 0xe79   :  { %2787 = vtanh.f32 %v1416_v53 }
 0xe7a   :  { %2789 = vtanh.f32 %v1511_v54  ;;  %v2825_v54 = vld [vmem:[%s3440_s1 + $0x18] sm:$0xff] }
 0xe84   :  { %v2784_v51 = vpop.eup %2783 }
 0xe85   :  { %v2786_v52 = vpop.eup %2785  ;;  %1423 = vrot.lane.b32.xlu0 %v2784_v51, %s2888_s23 }
 0xe86   :  { %1518 = vrot.lane.b32.xlu1 %v2786_v52, %s2888_s23  ;;  %v2788_v55 = vpop.eup %2787 }
 0xe87   :  { %v2790_v56 = vpop.eup %2789  ;;  %v1418_v57 = vmul.f32 0.5, %v2788_v55  ;;  %v2826_v55 = vld [vmem:[%s3440_s1 + $0x10] sm:$0xff] }
 0xe88   :  { %v1513_v58 = vmul.f32 0.5, %v2790_v56 }
 0xe89   :  { %v1419_v59 = vadd.f32 0.5, %v1418_v57  ;;  %v2827_v57 = vld [vmem:[%s3440_s1 + $0x8] sm:$0xff] }
 0xe8a   :  { %v1514_v60 = vadd.f32 0.5, %v1513_v58  ;;  %v2828_v58 = vld [vmem:[#allocation4 + $0x18] sm:$0xff] }
 0xe8b   :  { %v1421_v6 = vmul.f32 %v1419_v59, %v3247_v20 }
 0xe8c   :  { %v1516_v7 = vmul.f32 %v1514_v60, %v3251_v30 }
 0xef7   :  { %v1424_v61 = vpop.permute.xlu0 %1423 }
 0xef8   :  { %v1519_v62 = vpop.permute.xlu1 %1518  ;;  %v1426_v63 = vmul.f32 %v1424_v61, %v1419_v59  ;;  %v2831_v61 = vld [vmem:[#allocation4 + $0x10] sm:$0xff] }
 0xef9   :  { %v1521_v0 = vmul.f32 %v1519_v62, %v1514_v60  ;;  %v2832_v62 = vld [vmem:[%s3441_s2 + $0x10] sm:$0xff] }
 0xefa   :  { %1428 = vrot.lane.b32.xlu0 %v1426_v63, %s2889_s24  ;;  %v2833_v63 = vld [vmem:[#allocation4 + $0x8] sm:$0xff] }
 0xefb   :  { %1523 = vrot.lane.b32.xlu1 %v1521_v0, %s2889_s24  ;;  %v2834_v0 = vld [vmem:[%s3441_s2 + $0x8] sm:$0xff] }
 0xf6c   :  { %v1429_v8 = vpop.permute.xlu0 %1428 }
 0xf6d   :  { %v1524_v9 = vpop.permute.xlu1 %1523  ;;  %v3301_v10 = vadd.f32 %v1429_v8, %v1421_v6  ;;  %v2835_v6 = vld [vmem:[#allocation4] sm:$0xff] }
 0xf6e   :  { %v3303_v11 = vadd.f32 %v1524_v9, %v1516_v7  ;;  %v2836_v7 = vld [vmem:[%s3441_s2] sm:$0xff] }
 0xf6f   :  { %2791 = vtanh.f32 %v3301_v10 }
 0xf70   :  { %2793 = vtanh.f32 %v3303_v11 }
 0xf7c   :  { %v2792_v12 = vpop.eup %2791 }
 0xf7d   :  { %v2794_v13 = vpop.eup %2793  ;;  %1434 = vrot.lane.b32.xlu0 %v2792_v12, %s2888_s23  ;;  %v2328_v12 = vld [vmem:[%s3439_s0 + $0xe] sm:$0x3] }
 0xf7e   :  { %1529 = vrot.lane.b32.xlu1 %v2794_v13, %s2888_s23 }
 0xfef   :  { %v1435_v14 = vpop.permute.xlu0 %1434 }
 0xff0   :  { %v1530_v15 = vpop.permute.xlu1 %1529  ;;  %v1437_v16 = vmul.f32 %v1435_v14, %v1419_v59  ;;  %v2829_v59 = vld [vmem:[%s3440_s1] sm:$0xff] }
 0xff1   :  { %v1532_v17 = vmul.f32 %v1530_v15, %v1514_v60  ;;  %v2830_v60 = vld [vmem:[%s3441_s2 + $0x18] sm:$0xff] }
 0xff2   :  { %1534 = vrot.lane.b32.xlu0 %v1437_v16, %s2889_s24 }
 0xff3   :  { %1609 = vrot.lane.b32.xlu1 %v1532_v17, %s2889_s24 }
0x1064   :  { %v1535_v18 = vpop.permute.xlu0 %1534 }
0x1065   :  { %v1610_v19 = vpop.permute.xlu1 %1609  ;;  %2639 = vmatmul.mubr.msk.f32.vlgmr.msra.gmra.mxu0 %vm90_vm2, %v1535_v18 }
0x1066   :  { %2650 = vmatmul.mubr.msk.f32.vlgmr.msra.gmra.mxu1 %vm90_vm2, %v1610_v19  ;;  %2653 = vmatpush3.msra.mxu0 %v2958_v2 }
0x1067   :  { %2654 = vmatprep.subr.mxu0 %v2886_v1  ;;  %2660 = vmatprep.mubr.msk.f32.mxu0 %vm2887_vm1, %v2886_v1 }
0x1068   :  { %2655 = vmatpush3.msra.mxu0 %v2963_v3  ;;  %2664 = vmatpush3.msra.mxu1 %v2995_v23 }
0x1069   :  { %2656 = vmatprep.subr.mxu0 %v2886_v1  ;;  %2665 = vmatprep.subr.mxu1 %v2886_v1 }
0x106a   :  { %2657 = vmatpush3.msra.mxu0 %v2970_v4  ;;  %2666 = vmatpush3.msra.mxu1 %v2997_v24 }
0x106b   :  { %2658 = vmatprep.subr.mxu0 %v2886_v1  ;;  %2667 = vmatprep.subr.mxu1 %v2886_v1 }
0x106c   :  { %2659 = vmatpush3.msra.mxu0 %v2977_v5  ;;  %2668 = vmatpush3.msra.mxu1 %v3006_v26 }
0x106d   :  { %2661 = vmatmul.mubr.msk.f32.vlgmr.msra.gmra.mxu0 %vm90_vm2, %v1610_v19  ;;  %2669 = vmatprep.subr.mxu1 %v2886_v1 }
0x106e   :  { %2674 = vmatprep.subr.mxu0 %v2886_v1  ;;  %2670 = vmatpush3.msra.mxu1 %v3022_v29 }
0x106f   :  { %2675 = vmatpush3.msra.mxu0 %v3003_v25  ;;  %2671 = vmatprep.mubr.msk.f32.mxu1 %vm2887_vm1, %v2886_v1  ;;  %v2324_v25 = vld [vmem:[%s3439_s0 + $0xc] sm:$0x3] }
0x1070   :  { %2676 = vmatprep.subr.mxu0 %v2886_v1  ;;  %2685 = vmatprep.subr.mxu1 %v2886_v1 }
0x1071   :  { %2677 = vmatpush3.msra.mxu0 %v3012_v27  ;;  %2682 = vmatprep.mubr.msk.f32.mxu0 %vm2887_vm1, %v2886_v1 }
0x1072   :  { %2678 = vmatprep.subr.mxu0 %v2886_v1 }
0x1073   :  { %2679 = vmatpush3.msra.mxu0 %v3019_v28 }
0x1074   :  { %2680 = vmatprep.subr.mxu0 %v2886_v1 }
0x1075   :  { %2681 = vmatpush3.msra.mxu0 %v3032_v31 }
0x1076   :  { %2696 = vmatprep.subr.mxu0 %v2886_v1 }
0x1125   :  { %v1604_v2 = vpop.f32.mrf.mxu0 }
0x1126   :  { %v1679_v3 = vpop.f32.mrf.mxu1 }
0x1127   :  { %v1680_v4 = vadd.f32 %v1679_v3, %v1604_v2  ;;  %v2640_v5 = vpop.f32.mrf.mxu0 }
0x1128   :  { %v2651_v23 = vpop.f32.mrf.mxu1 }
0x1129   :  { %v1683_v24 = vadd.f32 %v3080_v39, %v1680_v4 }
0x112b   :  { %2795 = vtanh.f32 %v1683_v24  ;;  %v1684_v20 = vmul.f32 0.5, %v1683_v24 }
0x112d   :  { %v1774_v26 = vpop.f32.mrf.mxu0 }
0x112e   :  { %v1778_v27 = vadd.f32 %v2324_v25, %v1774_v26 }
0x112f   :  { %v2662_v28 = vpop.f32.mrf.mxu0 }
0x1130   :  { %2797 = vtanh.f32 %v1778_v27  ;;  %v1779_v21 = vmul.f32 0.5, %v1778_v27 }
0x1131   :  { %2799 = vtanh.f32 %v1684_v20 }
0x1132   :  { %2801 = vtanh.f32 %v1779_v21 }
0x1138   :  { %v2796_v29 = vpop.eup %2795 }
0x1139   :  { %1691 = vrot.lane.b32.xlu0 %v2796_v29, %s2888_s23 }
0x113d   :  { %v2798_v31 = vpop.eup %2797 }
0x113e   :  { %1786 = vrot.lane.b32.xlu1 %v2798_v31, %s2888_s23  ;;  %v2800_v22 = vpop.eup %2799 }
0x113f   :  { %v1686_v30 = vmul.f32 0.5, %v2800_v22  ;;  %v2802_v32 = vpop.eup %2801 }
0x1140   :  { %v1781_v35 = vmul.f32 0.5, %v2802_v32 }
0x1141   :  { %v1687_v33 = vadd.f32 0.5, %v1686_v30 }
0x1142   :  { %v1782_v37 = vadd.f32 0.5, %v1781_v35 }
0x1143   :  { %v1689_v41 = vmul.f32 %v1687_v33, %v3301_v10 }
0x1144   :  { %v1784_v44 = vmul.f32 %v1782_v37, %v3303_v11 }
0x11ab   :  { %v1692_v34 = vpop.permute.xlu0 %1691 }
0x11ac   :  { %v1694_v36 = vmul.f32 %v1692_v34, %v1687_v33 }
0x11ae   :  { %1696 = vrot.lane.b32.xlu0 %v1694_v36, %s2889_s24 }
0x11b0   :  { %v1787_v38 = vpop.permute.xlu1 %1786 }
0x11b1   :  { %v1789_v40 = vmul.f32 %v1787_v38, %v1782_v37 }
0x11b3   :  { %1791 = vrot.lane.b32.xlu1 %v1789_v40, %s2889_s24 }
0x1220   :  { %v1697_v42 = vpop.permute.xlu0 %1696 }
0x1221   :  { %v3353_v43 = vadd.f32 %v1697_v42, %v1689_v41 }
0x1223   :  { %2803 = vtanh.f32 %v3353_v43 }
0x1225   :  { %v1792_v45 = vpop.permute.xlu1 %1791 }
0x1226   :  { %v3357_v46 = vadd.f32 %v1792_v45, %v1784_v44 }
0x1228   :  { %2805 = vtanh.f32 %v3357_v46 }
0x1230   :  { %v2804_v47 = vpop.eup %2803 }
0x1231   :  { %1702 = vrot.lane.b32.xlu0 %v2804_v47, %s2888_s23 }
0x1235   :  { %v2806_v48 = vpop.eup %2805 }
0x1236   :  { %1797 = vrot.lane.b32.xlu1 %v2806_v48, %s2888_s23 }
0x12a3   :  { %v1703_v49 = vpop.permute.xlu0 %1702 }
0x12a4   :  { %v1705_v50 = vmul.f32 %v1703_v49, %v1687_v33 }
0x12a6   :  { %1802 = vrot.lane.b32.xlu0 %v1705_v50, %s2889_s24 }
0x12a8   :  { %v1798_v51 = vpop.permute.xlu1 %1797 }
0x12a9   :  { %v1800_v52 = vmul.f32 %v1798_v51, %v1782_v37 }
0x12ab   :  { %1877 = vrot.lane.b32.xlu1 %v1800_v52, %s2889_s24 }
0x1318   :  { %v1803_v53 = vpop.permute.xlu0 %1802 }
0x1319   :  { %2672 = vmatmul.mubr.msk.f32.vlgmr.msra.gmra.mxu1 %vm90_vm2, %v1803_v53 }
0x131a   :  { %2686 = vmatpush3.msra.mxu1 %v2825_v54  ;;  %2693 = vmatprep.mubr.msk.f32.mxu1 %vm2887_vm1, %v2886_v1 }
0x131b   :  { %2687 = vmatprep.subr.mxu1 %v2886_v1 }
0x131c   :  { %2688 = vmatpush3.msra.mxu1 %v2826_v55  ;;  %v2332_v55 = vld [vmem:[#allocation6] ss:$0 sm:$0xff] }
0x131d   :  { %2689 = vmatprep.subr.mxu1 %v2886_v1  ;;  %v1878_v56 = vpop.permute.xlu1 %1877 }
0x131e   :  { %2690 = vmatpush3.msra.mxu1 %v2827_v57  ;;  %2683 = vmatmul.mubr.msk.f32.vlgmr.msra.gmra.mxu0 %vm90_vm2, %v1878_v56 }
0x131f   :  { %2691 = vmatprep.subr.mxu1 %v2886_v1  ;;  %2697 = vmatpush3.msra.mxu0 %v2828_v58 }
0x1320   :  { %2692 = vmatpush3.msra.mxu1 %v2829_v59  ;;  %2698 = vmatprep.subr.mxu0 %v2886_v1 }
0x1321   :  { %2694 = vmatmul.mubr.msk.f32.vlgmr.msra.gmra.mxu1 %vm90_vm2, %v1878_v56  ;;  %2707 = vmatprep.subr.mxu1 %v2886_v1 }
0x1322   :  { %2708 = vmatpush3.msra.mxu1 %v2830_v60  ;;  %2699 = vmatpush3.msra.mxu0 %v2831_v61 }
0x1323   :  { %2709 = vmatprep.subr.mxu1 %v2886_v1  ;;  %2700 = vmatprep.subr.mxu0 %v2886_v1 }
0x1324   :  { %2710 = vmatpush3.msra.mxu1 %v2832_v62  ;;  %2701 = vmatpush3.msra.mxu0 %v2833_v63 }
0x1325   :  { %2711 = vmatprep.subr.mxu1 %v2886_v1  ;;  %2702 = vmatprep.subr.mxu0 %v2886_v1 }
0x1326   :  { %2712 = vmatpush3.msra.mxu1 %v2834_v0  ;;  %2715 = vmatprep.mubr.msk.f32.mxu1 %vm2887_vm1, %v2886_v1 }
0x1327   :  { %2713 = vmatprep.subr.mxu1 %v2886_v1  ;;  %2703 = vmatpush3.msra.mxu0 %v2835_v6 }
0x1328   :  { %2714 = vmatpush3.msra.mxu1 %v2836_v7  ;;  %2704 = vmatprep.mubr.msk.f32.mxu0 %vm2887_vm1, %v2886_v1 }
0x13d9   :  { %v1872_v8 = vpop.f32.mrf.mxu1 }
0x13db   :  { %v2673_v9 = vpop.f32.mrf.mxu1 }
0x13dc   :  { %v2891_v9 = vmov 0  }
0x13dd   :  { %2728 = vset.pattern.permute.xlu0 %v2891_v9 }
0x13de   :  { %v1947_v10 = vpop.f32.mrf.mxu0 }
0x13df   :  { %v1948_v11 = vadd.f32 %v1947_v10, %v1872_v8  ;;  %v2333_v10 = vld [vmem:[#allocation3] ss:$0 sm:$0xff] }
0x13e0   :  { %v2684_v13 = vpop.f32.mrf.mxu0 }
0x13e1   :  { %v1951_v14 = vadd.f32 %v3080_v39, %v1948_v11  ;;  %v2042_v15 = vpop.f32.mrf.mxu1 }
0x13e2   :  { %v2046_v16 = vadd.f32 %v2328_v12, %v2042_v15 }
0x13e3   :  { %2807 = vtanh.f32 %v1951_v14  ;;  %v2695_v17 = vpop.f32.mrf.mxu1  ;;  %v1952_v1 = vmul.f32 0.5, %v1951_v14 }
0x13e4   :  { %2809 = vtanh.f32 %v2046_v16  ;;  %v2047_v2 = vmul.f32 0.5, %v2046_v16 }
0x13e5   :  { %2811 = vtanh.f32 %v1952_v1 }
0x13e6   :  { %2813 = vtanh.f32 %v2047_v2 }
0x13f0   :  { %v2808_v18 = vpop.eup %2807 }
0x13f1   :  { %v2810_v19 = vpop.eup %2809  ;;  %1959 = vrot.lane.b32.xlu0 %v2808_v18, %s2888_s23 }
0x13f2   :  { %2054 = vrot.lane.b32.xlu1 %v2810_v19, %s2888_s23  ;;  %v2812_v3 = vpop.eup %2811 }
0x13f3   :  { %v2814_v4 = vpop.eup %2813  ;;  %v1954_v5 = vmul.f32 0.5, %v2812_v3 }
0x13f4   :  { %v2049_v23 = vmul.f32 0.5, %v2814_v4 }
0x13f5   :  { %v1955_v39 = vadd.f32 0.5, %v1954_v5 }
0x13f6   :  { %v2050_v24 = vadd.f32 0.5, %v2049_v23 }
0x13f7   :  { %v1957_v29 = vmul.f32 %v1955_v39, %v3353_v43 }
0x13f8   :  { %v2052_v31 = vmul.f32 %v2050_v24, %v3357_v46  ;;  %v2837_v46 = vld [vmem:[%s3443_s4] ss:$0 sm:$0xff] }
0x1463   :  { %v1960_v25 = vpop.permute.xlu0 %1959 }
0x1464   :  { %v2055_v26 = vpop.permute.xlu1 %2054  ;;  %v1962_v27 = vmul.f32 %v1960_v25, %v1955_v39 }
0x1465   :  { %v2057_v28 = vmul.f32 %v2055_v26, %v2050_v24 }
0x1466   :  { %1964 = vrot.lane.b32.xlu0 %v1962_v27, %s2889_s24 }
0x1467   :  { %2059 = vrot.lane.b32.xlu1 %v2057_v28, %s2889_s24 }
0x14d8   :  { %v1965_v20 = vpop.permute.xlu0 %1964 }
0x14d9   :  { %v2060_v21 = vpop.permute.xlu1 %2059  ;;  %v1967_v22 = vadd.f32 %v1965_v20, %v1957_v29 }
0x14da   :  { %v2062_v30 = vadd.f32 %v2060_v21, %v2052_v31 }
0x14db   :  { %2815 = vtanh.f32 %v1967_v22 }
0x14dc   :  { %2817 = vtanh.f32 %v2062_v30 }
0x14e8   :  { %v2816_v32 = vpop.eup %2815 }
0x14e9   :  { %v2818_v33 = vpop.eup %2817  ;;  %1970 = vrot.lane.b32.xlu0 %v2816_v32, %s2888_s23 }
0x14ea   :  { %2065 = vrot.lane.b32.xlu1 %v2818_v33, %s2888_s23 }
0x155b   :  { %v1971_v34 = vpop.permute.xlu0 %1970 }
0x155c   :  { %v2066_v35 = vpop.permute.xlu1 %2065  ;;  %v1973_v36 = vmul.f32 %v1971_v34, %v1955_v39 }
0x155d   :  { %v2068_v37 = vmul.f32 %v2066_v35, %v2050_v24 }
0x155e   :  { %2070 = vrot.lane.b32.xlu0 %v1973_v36, %s2889_s24 }
0x155f   :  { %2145 = vrot.lane.b32.xlu1 %v2068_v37, %s2889_s24 }
0x15d0   :  { %v2071_v38 = vpop.permute.xlu0 %2070 }
0x15d1   :  { %v2146_v40 = vpop.permute.xlu1 %2145  ;;  %2705 = vmatmul.mubr.msk.f32.vlgmr.msra.gmra.mxu0 %vm90_vm2, %v2071_v38 }
0x15d2   :  { %2244 = vst.msk [vmem:[#allocation2] sm:$0x3] %vm58_vm0, %v2146_v40  ;;  %2716 = vmatmul.mubr.msk.f32.vlgmr.msra.gmra.mxu1 %vm90_vm2, %v2146_v40 }
0x1691   :  { %v2140_v41 = vpop.f32.mrf.mxu0 }
0x1692   :  { %v2215_v42 = vpop.f32.mrf.mxu1 }
0x1693   :  { %v2216_v43 = vadd.f32 %v2215_v42, %v2140_v41  ;;  %v2706_v44 = vpop.f32.mrf.mxu0 }
0x1694   :  { %v2717_v45 = vpop.f32.mrf.mxu1 }
0x1695   :  { %v2219_v47 = vadd.f32 %v2837_v46, %v2216_v43 }
0x1697   :  { %2819 = vtanh.f32 %v2219_v47  ;;  %v2220_v49 = vmul.f32 0.5, %v2219_v47 }
0x1699   :  { %2821 = vtanh.f32 %v2220_v49 }
0x16a4   :  { %v2820_v48 = vpop.eup %2819 }
0x16a5   :  { %2227 = vrot.lane.b32.xlu0 %v2820_v48, %s2888_s23 }
0x16a6   :  { %v2822_v50 = vpop.eup %2821 }
0x16a7   :  { %v2222_v51 = vmul.f32 0.5, %v2822_v50 }
0x16a9   :  { %v2223_v52 = vadd.f32 0.5, %v2222_v51 }
0x16ab   :  { %v2225_v56 = vmul.f32 %v2223_v52, %v1967_v22 }
0x1717   :  { %v2228_v53 = vpop.permute.xlu0 %2227 }
0x1718   :  { %v2230_v54 = vmul.f32 %v2228_v53, %v2223_v52 }
0x171a   :  { %2232 = vrot.lane.b32.xlu1 %v2230_v54, %s2889_s24 }
0x171e   :  { %2269 = vrot.lane.b32.xlu1 %v2332_v55, %s2890_s5 }
0x178c   :  { %v2233_v57 = vpop.permute.xlu1 %2232 }
0x178d   :  { %v2235_v58 = vadd.f32 %v2233_v57, %v2225_v56 }
0x178f   :  { %2823 = vtanh.f32 %v2235_v58 }
0x1790   :  { %v2270_v61 = vpop.permute.xlu1 %2269 }
0x179c   :  { %v2824_v59 = vpop.eup %2823 }
0x179d   :  { %2238 = vrot.lane.b32.xlu0 %v2824_v59, %s2888_s23 }
0x180f   :  { %v2239_v60 = vpop.permute.xlu0 %2238 }
0x1810   :  { %v2241_v62 = vmul.f32 %v2239_v60, %v2223_v52 }
0x1812   :  { %v2272_v63 = vmul.f32 %v2270_v61, %v2241_v62 }
0x1814   :  { %2274 = vrot.lane.b32.xlu0 %v2272_v63, %s2889_s24 }
0x1818   :  { %2246 = vrot.lane.b32.xlu0 %v2062_v30, %s2890_s5 }
0x181c   :  { %2251 = vrot.lane.b32.xlu0 %v2241_v62, %s2889_s24 }
0x1886   :  { %v2275_v0 = vpop.permute.xlu0 %2274 }
0x1887   :  { %v2277_v6 = vsel %vm58_vm0, %v2275_v0, 0.0 }
0x1888   :  { %2278 = vadd.xlane.f32.xlu1 %v2277_v6 }
0x188a   :  { %v2247_v7 = vpop.permute.xlu0 %2246 }
0x188b   :  { %2249 = vst.msk [vmem:[#allocation2 + $0x2] sm:$0x3] %vm58_vm0, %v2247_v7 }
0x188e   :  { %v2252_v8 = vpop.permute.xlu0 %2251 }
0x188f   :  { %2254 = vst.msk [vmem:[#allocation2 + $0x4] sm:$0x3] %vm58_vm0, %v2252_v8 }
0x1911   :  { %v2279_v11 = vpop.xlane.xlu1 %2278 }
0x1912   :  { %v2287_v12 = vadd.f32 %v2333_v10, %v2279_v11 }
0x1914   :  { %2290 = vperm.xlu0 %2728, %v2287_v12  }
0x1918   :  { %2256 = vrot.lane.b32.xlu0 %v2235_v58, %s2890_s5 }
0x198f   :  { %v2291_v13 = vpop.permute.xlu0 %2290 }
0x1990   :  { %2293 = vst [vmem:[%s3446_s7] sm:$0x3] %v2291_v13 }
0x1993   :  { %v2257_v14 = vpop.permute.xlu0 %2256 }
0x1994   :  { %2259 = vst.msk [vmem:[#allocation2 + $0x6] sm:$0x3] %vm58_vm0, %v2257_v14 }
0x1995   :  { %2298 = vsyncpa [#allocation5], 1 }
0x1996   :  { %2299 = vsyncpa [#allocation7], 1 }

</bundles_post_ra>
